<compile_context>
chip_gen: v6e
topology: v6e:2x2x1
jax: 0.10.0
libtpu: 0.0.40
codegen_flags: <defaults>
</compile_context>

<pallas_src>
import functools
import math

import jax
import jax.numpy as jnp
from jax.experimental import pallas as pl
from jax.experimental.pallas import tpu as pltpu


# --------------------------- hardware-aware config ---------------------------

def _tpu_vmem_capacity_bytes():
    try:
        info = pltpu.get_tpu_info()
        for name in ("vmem_capacity_bytes", "vmem_size_bytes", "vmem_bytes"):
            v = getattr(info, name, None)
            if v:
                return int(v)
    except Exception:
        pass
    return 128 * 1024 * 1024  # v5e/v6e default


_VMEM_CAP = _tpu_vmem_capacity_bytes()
# Leave headroom for compiler-internal scratch and double-buffered outputs.
_VMEM_LIMIT = min((_VMEM_CAP * 5) // 8, 100 * 1024 * 1024)
_BIG_VMEM = _VMEM_CAP > (96 << 20)            # 128 MiB on v5e/v6e, 64 MiB on v7x
_ROW_TILE_BIG = 1024 if _BIG_VMEM else 512    # streaming row kernels (fused tail)
_ROW_TILE_MED = 512 if _BIG_VMEM else 256     # AIFI epilogue S tile
_HID_TILE = 1024 if _BIG_VMEM else 512        # AIFI FFN hidden-dim tile
_KV_TILE = 512                                # attention KV tile (flash)


def _pick_tile(n, target, align=8):
    """Largest divisor of n that is <= target, preferring multiples of `align`."""
    if n <= target:
        return n
    best = 1
    for t in range(min(target, n), 0, -1):
        if n % t == 0:
            if t % align == 0:
                return t
            if best == 1:
                best = t
    return best


# ----------------------------- shared math helpers -----------------------------

def _layernorm(x, g, b, eps=1e-5):
    mu = jnp.mean(x, axis=-1, keepdims=True)
    var = jnp.mean((x - mu) ** 2, axis=-1, keepdims=True)
    return (x - mu) * jax.lax.rsqrt(var + eps) * g + b


_GELU_C = math.sqrt(2.0 / math.pi)


def _gelu(x):
    # tanh-approx GELU (TPU-safe lowering; see TODO in header).
    return 0.5 * x * (1.0 + jnp.tanh(_GELU_C * (x + 0.044715 * x * x * x)))


def build_2d_sincos_pos(w, h, c, temperature=10000.0):
    # Faithful to AIFI.build_2d_sincos_position_embedding (meshgrid indexing='ij')
    grid_w = jnp.arange(w, dtype=jnp.float32)
    grid_h = jnp.arange(h, dtype=jnp.float32)
    gw, gh = jnp.meshgrid(grid_w, grid_h, indexing="ij")
    pos_dim = c // 4
    omega = jnp.arange(pos_dim, dtype=jnp.float32) / pos_dim
    omega = 1.0 / (temperature ** omega)
    out_w = gw.reshape(-1, 1) * omega[None, :]
    out_h = gh.reshape(-1, 1) * omega[None, :]
    return jnp.concatenate(
        [jnp.sin(out_w), jnp.cos(out_w), jnp.sin(out_h), jnp.cos(out_h)], axis=1
    )  # (h*w, c)


def _const_spec(arr, grid_rank):
    """Full-array BlockSpec with a constant index map (grid-invariant operand)."""
    nd = arr.ndim
    zeros = (0,) * nd
    if grid_rank == 3:
        return pl.BlockSpec(tuple(arr.shape), lambda i, j, k: zeros)
    if grid_rank == 2:
        return pl.BlockSpec(tuple(arr.shape), lambda i, j: zeros)
    return pl.BlockSpec(tuple(arr.shape), lambda i: zeros)


# --------------------- kernel 1: flash attention + spatial sum ---------------------

def _mha_flash_kernel(src_ref, pos_ref, wq_ref, wk_ref, wv_ref,
                      bq_ref, bk_ref, bv_ref,
                      ctx_ref, xsum_ref,
                      qk_sc, q_sc, m_sc, l_sc, acc_sc,
                      *, sm_scale, tkv, approx_recip):
    h = pl.program_id(1)
    kv = pl.program_id(2)
    n_kv = pl.num_programs(2)
    cdt = src_ref.dtype

    # Once per batch: src+pos into a VMEM scratch (reused by every head / KV
    # step) and the spatial sum for the global branch (fused: no extra HBM pass
    # over x just to compute a mean).
    @pl.when((h == 0) & (kv == 0))
    def _():
        src = src_ref[...]
        qk_sc[...] = (src.astype(jnp.float32)
                      + pos_ref[...].astype(jnp.float32)).astype(cdt)
        xsum_ref[...] = jnp.sum(src.astype(jnp.float32), axis=0, keepdims=True)

    # Once per (batch, head): Q for all rows + online-softmax state init.
    @pl.when(kv == 0)
    def _():
        q = jnp.dot(qk_sc[...], wq_ref[...],
                    preferred_element_type=jnp.float32) + bq_ref[...]
        q_sc[...] = q.astype(cdt)
        m_sc[...] = jnp.full(m_sc.shape, -jnp.inf, jnp.float32)
        l_sc[...] = jnp.zeros(l_sc.shape, jnp.float32)
        acc_sc[...] = jnp.zeros(acc_sc.shape, jnp.float32)

    # Current KV tile: K/V from per-head weight column blocks (no lane slicing).
    start = pl.multiple_of(kv * tkv, tkv)
    qk_t = qk_sc[pl.ds(start, tkv), :]                      # (tkv, C)
    src_t = src_ref[pl.ds(start, tkv), :]                   # (tkv, C)
    k_t = jnp.dot(qk_t, wk_ref[...],
                  preferred_element_type=jnp.float32) + bk_ref[...]
    v_t = jnp.dot(src_t, wv_ref[...],
                  preferred_element_type=jnp.float32) + bv_ref[...]

    # Q.K^T contracting the head dim (no explicit transpose), online softmax.
    logits = jax.lax.dot_general(
        q_sc[...], k_t.astype(cdt),
        (((1,), (1,)), ((), ())),
        preferred_element_type=jnp.float32) * sm_scale       # (S, tkv)
    m_new = jnp.maximum(m_sc[...], jnp.max(logits, axis=-1, keepdims=True))
    alpha = jnp.exp(m_sc[...] - m_new)
    p = jnp.exp(logits - m_new)
    l_sc[...] = alpha * l_sc[...] + jnp.sum(p, axis=-1, keepdims=True)
    acc_sc[...] = alpha * acc_sc[...] + jnp.dot(
        p.astype(cdt), v_t.astype(cdt), preferred_element_type=jnp.float32)
    m_sc[...] = m_new

    @pl.when(kv == n_kv - 1)
    def _():
        if approx_recip:
            inv = pl.reciprocal(l_sc[...], approx=True)      # EUP slot
        else:
            inv = 1.0 / l_sc[...]                            # exact for f32 path
        ctx_ref[...] = (acc_sc[...] * inv).astype(ctx_ref.dtype)


def mha_heads(x_bsc, pos, kp, *, num_heads, kv_tile, approx_recip):
    B, S, C = x_bsc.shape
    nh = num_heads
    dh = C // nh
    tkv = _pick_tile(S, kv_tile)
    n_kv = S // tkv
    sm_scale = 1.0 / math.sqrt(dh)
    cd = x_bsc.dtype

    w_spec = pl.BlockSpec((None, C, dh), lambda b, h, kv: (h, 0, 0))
    b_spec = pl.BlockSpec((None, 1, dh), lambda b, h, kv: (h, 0, 0))
    kernel = functools.partial(_mha_flash_kernel, sm_scale=sm_scale, tkv=tkv,
                               approx_recip=approx_recip)
    return pl.pallas_call(
        kernel,
        out_shape=(jax.ShapeDtypeStruct((B, nh, S, dh), cd),
                   jax.ShapeDtypeStruct((B, 1, C), jnp.float32)),
        grid_spec=pltpu.PrefetchScalarGridSpec(
            num_scalar_prefetch=0,
            grid=(B, nh, n_kv),
            in_specs=[
                pl.BlockSpec((None, S, C), lambda b, h, kv: (b, 0, 0)),
                pl.BlockSpec((S, C), lambda b, h, kv: (0, 0)),
                w_spec, w_spec, w_spec, b_spec, b_spec, b_spec,
            ],
            out_specs=(
                pl.BlockSpec((None, None, S, dh), lambda b, h, kv: (b, h, 0, 0)),
                pl.BlockSpec((None, 1, C), lambda b, h, kv: (b, 0, 0)),
            ),
            scratch_shapes=[
                pltpu.VMEM((S, C), cd),              # src + pos (per batch)
                pltpu.VMEM((S, dh), cd),             # per-head Q
                pltpu.VMEM((S, 1), jnp.float32),     # online-softmax m
                pltpu.VMEM((S, 1), jnp.float32),     # online-softmax l
                pltpu.VMEM((S, dh), jnp.float32),    # online-softmax acc
            ]),
        compiler_params=pltpu.CompilerParams(
            # head / KV axes must be sequential (scratch reuse across them).
            dimension_semantics=("parallel", "arbitrary", "arbitrary"),
            vmem_limit_bytes=_VMEM_LIMIT),
    )(x_bsc, pos, kp['wq_h'], kp['wk_h'], kp['wv_h'],
      kp['bq_h'], kp['bk_h'], kp['bv_h'])


# ------------- kernel 2: AIFI epilogue (out-proj + LN1 + FFN + LN2) -------------

def _aifi_epilogue_kernel(src_ref, ctx_ref, w1_ref, b1_ref, w2_ref,
                          wo_ref, bo_ref, b2_ref, ln1g_ref, ln1b_ref,
                          ln2g_ref, ln2b_ref,
                          o_ref, x32_sc, xcd_sc, acc_sc):
    k = pl.program_id(2)

    @pl.when(k == 0)
    def _():
        # Single out-projection matmul (heads already concatenated in layout).
        attn = jnp.dot(ctx_ref[...], wo_ref[...],
                       preferred_element_type=jnp.float32) + bo_ref[...]
        x = _layernorm(src_ref[...].astype(jnp.float32) + attn,
                       ln1g_ref[...], ln1b_ref[...])
        x32_sc[...] = x
        xcd_sc[...] = x.astype(xcd_sc.dtype)
        acc_sc[...] = jnp.zeros(acc_sc.shape, jnp.float32)

    # FFN chunk over the hidden dim (exact: GELU is per-hidden-unit).
    hmid = _gelu(jnp.dot(xcd_sc[...], w1_ref[...],
                         preferred_element_type=jnp.float32) + b1_ref[...])
    acc_sc[...] += jnp.dot(hmid.astype(xcd_sc.dtype), w2_ref[...],
                           preferred_element_type=jnp.float32)

    @pl.when(k == pl.num_programs(2) - 1)
    def _():
        y = _layernorm(x32_sc[...] + acc_sc[...] + b2_ref[...],
                       ln2g_ref[...], ln2b_ref[...])
        o_ref[...] = y.astype(o_ref.dtype)


def aifi_epilogue(x_bsc, ctx_flat, kp, *, tile_s, tile_hidden):
    B, S, C = x_bsc.shape
    hidden = kp['w1'].shape[1]
    ts = _pick_tile(S, tile_s)
    tk = _pick_tile(hidden, tile_hidden)
    cd = x_bsc.dtype
    const_names = ['wo', 'bo', 'b2', 'ln1g', 'ln1b', 'ln2g', 'ln2b']
    const_specs = [_const_spec(kp[n], 3) for n in const_names]
    return pl.pallas_call(
        _aifi_epilogue_kernel,
        out_shape=jax.ShapeDtypeStruct((B, S, C), cd),
        grid_spec=pltpu.PrefetchScalarGridSpec(
            num_scalar_prefetch=0,
            grid=(B, S // ts, hidden // tk),
            in_specs=[
                pl.BlockSpec((None, ts, C), lambda b, s, k: (b, s, 0)),
                pl.BlockSpec((None, ts, C), lambda b, s, k: (b, s, 0)),
                pl.BlockSpec((C, tk), lambda b, s, k: (0, k)),      # w1 cols
                pl.BlockSpec((1, tk), lambda b, s, k: (0, k)),      # b1
                pl.BlockSpec((tk, C), lambda b, s, k: (k, 0)),      # w2 rows
            ] + const_specs,
            out_specs=pl.BlockSpec((None, ts, C), lambda b, s, k: (b, s, 0)),
            scratch_shapes=[
                pltpu.VMEM((ts, C), jnp.float32),   # LN1 output (f32)
                pltpu.VMEM((ts, C), cd),            # LN1 output (matmul dtype)
                pltpu.VMEM((ts, C), jnp.float32),   # FFN accumulator
            ]),
        compiler_params=pltpu.CompilerParams(
            dimension_semantics=("parallel", "parallel", "arbitrary"),
            vmem_limit_bytes=_VMEM_LIMIT),
    )(x_bsc, ctx_flat, kp['w1'], kp['b1'], kp['w2'],
      *[kp[n] for n in const_names])


# --------- kernel 3: fused tail (branch1 + NAM gate + conv_cat + ReLU) ---------

def _fused_tail_kernel(x_ref, x1_ref, gfb_ref, wb1_ref, bb1_ref,
                       gsc0_ref, gsh0_ref, gsc1_ref, gsh1_ref,
                       wcc0_ref, wcc1_ref, o_ref):
    # concat([x0, x1, gf]) -> NAM channel attention -> conv_cat(+BN) -> ReLU,
    # with branch1 computed in-kernel from the x tile (no x0 HBM round trip)
    # and the global-feature contribution folded into a per-batch bias.
    cdt = x_ref.dtype

    x0 = jnp.maximum(
        jnp.dot(x_ref[...], wb1_ref[...],
                preferred_element_type=jnp.float32) + bb1_ref[...], 0.0)
    a0 = jax.nn.sigmoid(x0 * gsc0_ref[...] + gsh0_ref[...]) * x0
    acc = jnp.dot(a0.astype(cdt), wcc0_ref[...],
                  preferred_element_type=jnp.float32)

    x1 = x1_ref[...].astype(jnp.float32)
    a1 = jax.nn.sigmoid(x1 * gsc1_ref[...] + gsh1_ref[...]) * x1
    acc = acc + jnp.dot(a1.astype(cdt), wcc1_ref[...],
                        preferred_element_type=jnp.float32)

    y = acc + gfb_ref[...]                      # gf conv_cat contribution + bias
    o_ref[...] = jnp.maximum(y, 0.0).astype(o_ref.dtype)


def fused_tail(x_bsc, x1, gf_bias, kp, *, tile_s):
    B, S, Cin = x_bsc.shape
    Cout = kp['w_b1'].shape[1]
    ts = _pick_tile(S, tile_s)
    names = ['w_b1', 'b_b1', 'gsc0', 'gsh0', 'gsc1', 'gsh1', 'wcc0', 'wcc1']
    wspecs = [_const_spec(kp[n], 2) for n in names]
    return pl.pallas_call(
        _fused_tail_kernel,
        out_shape=jax.ShapeDtypeStruct((B, S, Cout), x_bsc.dtype),
        grid_spec=pltpu.PrefetchScalarGridSpec(
            num_scalar_prefetch=0,
            grid=(B, S // ts),
            in_specs=[
                pl.BlockSpec((None, ts, Cin), lambda b, i: (b, i, 0)),
                pl.BlockSpec((None, ts, Cin), lambda b, i: (b, i, 0)),
                pl.BlockSpec((None, 1, Cout), lambda b, i: (b, 0, 0)),
            ] + wspecs,
            out_specs=pl.BlockSpec((None, ts, Cout), lambda b, i: (b, i, 0)),
        ),
        compiler_params=pltpu.CompilerParams(
            dimension_semantics=("parallel", "parallel"),
            vmem_limit_bytes=_VMEM_LIMIT),
    )(x_bsc, x1, gf_bias, *[kp[n] for n in names])


# ----------------------------- parameter preparation -----------------------------

def prepare_kernel_params(p, *, num_heads, compute_dtype=jnp.bfloat16):
    """Fold BN into conv weights, fold NAM gate, split per-head weights, cast."""
    C = p['wq'].shape[0]
    nh = num_heads
    dh = C // nh
    cd = compute_dtype
    kp = {}

    # branch1: fold inference BN (used inside fused tail kernel).
    kp['w_b1'] = (p['w_b1'] * p['sc_b1']).astype(cd)
    kp['b_b1'] = p['b_b1'] * p['sc_b1'] + p['sh_b1']
    # branch5 (global feature): folded; tiny per-batch matmul stays in plain JAX.
    kp['w_b5'] = p['w_b5'] * p['sc_b5']
    kp['b_b5'] = p['b_b5'] * p['sc_b5'] + p['sh_b5']

    # conv_cat: fold BN, split rows along the concat order [x0 | x1 | gf].
    w_cc = p['w_cc'] * p['sc_cc']
    b_cc = p['b_cc'] * p['sc_cc'] + p['sh_cc']
    Cout = w_cc.shape[1]
    kp['wcc0'] = w_cc[:Cout].astype(cd)
    kp['wcc1'] = w_cc[Cout:Cout + C].astype(cd)
    kp['wcc2'] = w_cc[Cout + C:]          # f32, host side (gf contribution)
    kp['b_cc'] = b_cc                     # f32, folded into the gf bias

    # NAM gate: sigmoid((f*sc+sh)*w) == sigmoid(f*(sc*w) + sh*w); split by slice.
    gsc = p['nam_sc'] * p['nam_wch']
    gsh = p['nam_sh'] * p['nam_wch']
    kp['gsc0'], kp['gsc1'], kp['gsc2'] = gsc[:, :Cout], gsc[:, Cout:Cout + C], gsc[:, Cout + C:]
    kp['gsh0'], kp['gsh1'], kp['gsh2'] = gsh[:, :Cout], gsh[:, Cout:Cout + C], gsh[:, Cout + C:]

    # AIFI attention: per-head Q/K/V weight column blocks (nh, C, dh) / (nh, 1, dh).
    def per_head_w(w):
        return jnp.transpose(w.reshape(C, nh, dh), (1, 0, 2)).astype(cd)

    def per_head_b(b):
        return b.reshape(nh, dh)[:, None, :]  # f32

    kp['wq_h'] = per_head_w(p['wq'])
    kp['wk_h'] = per_head_w(p['wk'])
    kp['wv_h'] = per_head_w(p['wv'])
    kp['bq_h'] = per_head_b(p['bq'])
    kp['bk_h'] = per_head_b(p['bk'])
    kp['bv_h'] = per_head_b(p['bv'])

    # AIFI out-projection (single (C,C) matmul) + FFN + LayerNorms.
    kp['wo'] = p['wo'].astype(cd)
    kp['bo'] = p['bo']
    kp['w1'] = p['w1'].astype(cd)
    kp['b1'] = p['b1']
    kp['w2'] = p['w2'].astype(cd)
    kp['b2'] = p['b2']
    for n in ['ln1g', 'ln1b', 'ln2g', 'ln2b']:
        kp[n] = p[n]
    return kp


# ----------------------------- TransEnc forward -----------------------------

def trans_enc_forward(x_nchw, p, *, num_heads=8, compute_dtype=jnp.bfloat16):
    B, Cin, H, W = x_nchw.shape
    assert Cin % num_heads == 0, "dim_in must be divisible by num_heads"
    assert Cin % 4 == 0, "dim_in must be divisible by 4 for the sincos embedding"
    S = H * W
    cd = compute_dtype

    kp = prepare_kernel_params(p, num_heads=num_heads, compute_dtype=cd)
    Cout = kp['w_b1'].shape[1]

    x_bsc = jnp.transpose(x_nchw, (0, 2, 3, 1)).reshape(B, S, Cin).astype(cd)
    pos = build_2d_sincos_pos(W, H, Cin).astype(cd)

    # AIFI attention (flash-tiled over KV) fused with the per-batch spatial sum
    # that the global branch needs -- one streaming pass over x for both.
    approx = jnp.dtype(cd) != jnp.dtype(jnp.float32)
    ctx, xsum = mha_heads(x_bsc, pos, kp, num_heads=num_heads,
                          kv_tile=_KV_TILE, approx_recip=approx)
    # Head outputs -> (B, S, C) so the out-projection is one (ts,C)x(C,C) matmul.
    ctx_flat = jnp.transpose(ctx, (0, 2, 1, 3)).reshape(B, S, Cin)

    # AIFI epilogue: out-proj + LN1 + FFN (hidden-dim tiled) + LN2, S-tiled.
    x1 = aifi_epilogue(x_bsc, ctx_flat, kp,
                       tile_s=_ROW_TILE_MED, tile_hidden=_HID_TILE)

    # Global branch: tiny per-batch math in plain JAX (bilinear upsample of a
    # 1x1 map is a broadcast).  Its NAM-gated conv_cat contribution + conv_cat
    # bias are folded into ONE per-batch (1, Cout) bias for the fused tail.
    gmean = xsum.reshape(B, Cin) / float(S)
    gf = jax.nn.relu(gmean @ kp['w_b5'] + kp['b_b5'])                 # (B, Cout)
    a2 = jax.nn.sigmoid(gf * kp['gsc2'] + kp['gsh2']) * gf
    gf_bias = (a2 @ kp['wcc2'] + kp['b_cc'])[:, None, :]              # (B, 1, Cout)

    # Fused branch1 + NAM channel attention + conv_cat(+BN) + ReLU.
    out = fused_tail(x_bsc, x1, gf_bias, kp, tile_s=_ROW_TILE_BIG)    # (B, S, Cout)
    return jnp.transpose(out.reshape(B, H, W, Cout), (0, 3, 1, 2))    # NCHW


# ----------------------------- pure-JAX reference -----------------------------

def reference_forward(x_nchw, p, *, num_heads=8):
    B, Cin, H, W = x_nchw.shape
    S = H * W
    dh = Cin // num_heads
    x = jnp.transpose(x_nchw, (0, 2, 3, 1)).reshape(B, S, Cin).astype(jnp.float32)

    def pwcbr(z, w, b, sc, sh):
        return jax.nn.relu((z @ w + b) * sc + sh)

    x0 = pwcbr(x.reshape(B * S, Cin), p['w_b1'], p['b_b1'], p['sc_b1'], p['sh_b1'])
    Cout = x0.shape[-1]
    x0 = x0.reshape(B, S, Cout)

    pos = build_2d_sincos_pos(W, H, Cin)

    def aifi_one(src):
        qk = src + pos
        q = qk @ p['wq'] + p['bq']
        k = qk @ p['wk'] + p['bk']
        v = src @ p['wv'] + p['bv']
        outs = []
        for h in range(num_heads):
            sl = slice(h * dh, (h + 1) * dh)
            logits = (q[:, sl] @ k[:, sl].T) / math.sqrt(dh)
            outs.append(jax.nn.softmax(logits, axis=-1) @ v[:, sl])
        a = jnp.concatenate(outs, axis=-1) @ p['wo'] + p['bo']
        s1 = _layernorm(src + a, p['ln1g'], p['ln1b'])
        f = _gelu(s1 @ p['w1'] + p['b1']) @ p['w2'] + p['b2']
        return _layernorm(s1 + f, p['ln2g'], p['ln2b'])

    x1 = jax.vmap(aifi_one)(x)

    gm = jnp.mean(x, axis=1)                                   # (B, Cin)
    gf = pwcbr(gm, p['w_b5'], p['b_b5'], p['sc_b5'], p['sh_b5']).reshape(B, 1, Cout)
    gf = jnp.broadcast_to(gf, (B, S, Cout))

    feat = jnp.concatenate([x0, x1, gf], axis=-1)
    y = feat * p['nam_sc'] + p['nam_sh']
    att = jax.nn.sigmoid(y * p['nam_wch']) * feat
    out = pwcbr(att.reshape(B * S, -1), p['w_cc'], p['b_cc'], p['sc_cc'], p['sh_cc'])
    out = out.reshape(B, H, W, Cout)
    return jnp.transpose(out, (0, 3, 1, 2))


# ----------------------------- parameter init -----------------------------

def init_params(key, *, dim_in, dim_out, aifi_hidden):
    Ccat = 2 * dim_out + dim_in
    kit = iter(jax.random.split(key, 64))

    def nrm(shape, scale=0.05):
        return scale * jax.random.normal(next(kit), shape, jnp.float32)

    def bn_affine(c):
        gamma = 0.5 + jax.random.uniform(next(kit), (c,), jnp.float32)
        beta = nrm((c,), 0.1)
        rmean = nrm((c,), 0.1)
        rvar = 0.5 + jax.random.uniform(next(kit), (c,), jnp.float32)
        eps = 1e-5
        sc = gamma / jnp.sqrt(rvar + eps)
        sh = beta - rmean * sc
        return gamma, sc.reshape(1, c), sh.reshape(1, c)

    p = {}
    # branch1
    p['w_b1'] = nrm((dim_in, dim_out)); p['b_b1'] = nrm((1, dim_out), 0.02)
    _, p['sc_b1'], p['sh_b1'] = bn_affine(dim_out)
    # branch5 (global feature)
    p['w_b5'] = nrm((dim_in, dim_out)); p['b_b5'] = nrm((1, dim_out), 0.02)
    _, p['sc_b5'], p['sh_b5'] = bn_affine(dim_out)
    # conv_cat
    p['w_cc'] = nrm((Ccat, dim_out)); p['b_cc'] = nrm((1, dim_out), 0.02)
    _, p['sc_cc'], p['sh_cc'] = bn_affine(dim_out)
    # NAM channel attention
    g, p['nam_sc'], p['nam_sh'] = bn_affine(Ccat)
    p['nam_wch'] = (jnp.abs(g) / jnp.sum(jnp.abs(g))).reshape(1, Ccat)
    # AIFI transformer-encoder layer
    for n in ['wq', 'wk', 'wv', 'wo']:
        p[n] = nrm((dim_in, dim_in))
    for n in ['bq', 'bk', 'bv', 'bo']:
        p[n] = nrm((1, dim_in), 0.02)
    p['w1'] = nrm((dim_in, aifi_hidden)); p['b1'] = nrm((1, aifi_hidden), 0.02)
    p['w2'] = nrm((aifi_hidden, dim_in)); p['b2'] = nrm((1, dim_in), 0.02)
    p['ln1g'] = 1.0 + nrm((1, dim_in), 0.05); p['ln1b'] = nrm((1, dim_in), 0.05)
    p['ln2g'] = 1.0 + nrm((1, dim_in), 0.05); p['ln2b'] = nrm((1, dim_in), 0.05)
    return p


# ----------------------------- main -----------------------------

if __name__ == "__main__":
    # Small shapes consistent with the module (scaled down from 2048/256/1024).
    B, H, W = 2, 8, 8
    dim_in, dim_out, aifi_hidden, num_heads = 64, 16, 64, 8

    key = jax.random.PRNGKey(0)
    kx, kparams = jax.random.split(key)
    x = jax.random.normal(kx, (B, dim_in, H, W), jnp.float32)   # NCHW like PyTorch
    params = init_params(kparams, dim_in=dim_in, dim_out=dim_out,
                         aifi_hidden=aifi_hidden)

    ref = reference_forward(x, params, num_heads=num_heads)

    # f32 compute path: tight check that the kernel math matches the module.
    out_f32 = trans_enc_forward(x, params, num_heads=num_heads,
                                compute_dtype=jnp.float32)
    out_f32 = jax.block_until_ready(out_f32)
    assert out_f32.shape == (B, dim_out, H, W), out_f32.shape
    assert jnp.allclose(out_f32, ref, rtol=1e-2, atol=1e-2), \
        float(jnp.max(jnp.abs(out_f32 - ref)))

    # bf16 fast path (production configuration): bf16-level tolerance.
    out_bf16 = trans_enc_forward(x, params, num_heads=num_heads,
                                 compute_dtype=jnp.bfloat16)
    out_bf16 = jax.block_until_ready(out_bf16)
    assert out_bf16.shape == (B, dim_out, H, W), out_bf16.shape
    out_bf16_f = out_bf16.astype(jnp.float32)
    assert jnp.allclose(out_bf16_f, ref, rtol=1e-1, atol=1e-1), \
        float(jnp.max(jnp.abs(out_bf16_f - ref)))

    print("KERNEL_OK")
</pallas_src>

<mosaic_0001>
module attributes {stable_mosaic.version = 11 : i64} {
  func.func @_mha_flash_kernel(%arg0: i32, %arg1: i32, %arg2: i32, %arg3: memref<1x64x64xf32, #tpu.memory_space<vmem>>, %arg4: memref<64x64xf32, #tpu.memory_space<vmem>>, %arg5: memref<1x64x8xf32, #tpu.memory_space<vmem>>, %arg6: memref<1x64x8xf32, #tpu.memory_space<vmem>>, %arg7: memref<1x64x8xf32, #tpu.memory_space<vmem>>, %arg8: memref<1x1x8xf32, #tpu.memory_space<vmem>>, %arg9: memref<1x1x8xf32, #tpu.memory_space<vmem>>, %arg10: memref<1x1x8xf32, #tpu.memory_space<vmem>>, %arg11: memref<1x1x64x8xf32, #tpu.memory_space<vmem>>, %arg12: memref<1x1x64xf32, #tpu.memory_space<vmem>>, %arg13: memref<64x64xf32, #tpu.memory_space<vmem>>, %arg14: memref<64x8xf32, #tpu.memory_space<vmem>>, %arg15: memref<64x1xf32, #tpu.memory_space<vmem>>, %arg16: memref<64x1xf32, #tpu.memory_space<vmem>>, %arg17: memref<64x8xf32, #tpu.memory_space<vmem>>) attributes {dimension_semantics = [#tpu.dimension_semantics<parallel>, #tpu.dimension_semantics<arbitrary>, #tpu.dimension_semantics<arbitrary>], iteration_bounds = array<i64: 2, 8, 1>, scalar_prefetch = 0 : i64, scratch_operands = 5 : i64, tpu.core_type = #tpu.core_type<tc>, window_params = [{transform_indices = @transform_0, window_bounds = array<i64: 1, 64, 64>}, {pipeline_mode = #tpu.pipeline_mode<synchronous>, transform_indices = @transform_1, window_bounds = array<i64: 64, 64>}, {transform_indices = @transform_2, window_bounds = array<i64: 1, 64, 8>}, {transform_indices = @transform_3, window_bounds = array<i64: 1, 64, 8>}, {transform_indices = @transform_4, window_bounds = array<i64: 1, 64, 8>}, {transform_indices = @transform_5, window_bounds = array<i64: 1, 1, 8>}, {transform_indices = @transform_6, window_bounds = array<i64: 1, 1, 8>}, {transform_indices = @transform_7, window_bounds = array<i64: 1, 1, 8>}, {transform_indices = @transform_8, window_bounds = array<i64: 1, 1, 64, 8>}, {transform_indices = @transform_9, window_bounds = array<i64: 1, 1, 64>}]} {
    %c0_i32 = arith.constant 0 : i32
    %0 = arith.cmpi eq, %arg1, %c0_i32 : i32
    %c0_i32_0 = arith.constant 0 : i32
    %1 = arith.cmpi eq, %arg2, %c0_i32_0 : i32
    %2 = arith.andi %0, %1 : i1
    %3 = arith.extui %2 : i1 to i32
    %c0_i32_1 = arith.constant 0 : i32
    %4 = arith.cmpi ne, %3, %c0_i32_1 : i32
    scf.if %4 {
      %c0_42 = arith.constant 0 : index
      %c0_43 = arith.constant 0 : index
      %c0_44 = arith.constant 0 : index
      %59 = vector.load %arg3[%c0_42, %c0_43, %c0_44] : memref<1x64x64xf32, #tpu.memory_space<vmem>>, vector<1x64x64xf32>
      %60 = vector.shape_cast %59 : vector<1x64x64xf32> to vector<64x64xf32>
      %c0_45 = arith.constant 0 : index
      %c0_46 = arith.constant 0 : index
      %61 = vector.load %arg4[%c0_45, %c0_46] : memref<64x64xf32, #tpu.memory_space<vmem>>, vector<64x64xf32>
      %62 = arith.addf %60, %61 : vector<64x64xf32>
      %c0_47 = arith.constant 0 : index
      %c0_48 = arith.constant 0 : index
      %63 = vector.load %arg13[%c0_47, %c0_48] : memref<64x64xf32, #tpu.memory_space<vmem>>, vector<64x64xf32>
      tpu.vector_store %arg13[%c0_47, %c0_48], %62 {strides = array<i32>} : memref<64x64xf32, #tpu.memory_space<vmem>>, vector<64x64xf32>,
      %cst_49 = arith.constant dense<0.000000e+00> : vector<64xf32>
      %64 = vector.multi_reduction <add>, %60, %cst_49 [0] : vector<64x64xf32> to vector<64xf32>
      %65 = vector.shape_cast %64 : vector<64xf32> to vector<1x64xf32>
      %c0_50 = arith.constant 0 : index
      %c0_51 = arith.constant 0 : index
      %c0_52 = arith.constant 0 : index
      %66 = vector.load %arg12[%c0_50, %c0_51, %c0_52] : memref<1x1x64xf32, #tpu.memory_space<vmem>>, vector<1x1x64xf32>
      %67 = vector.shape_cast %66 : vector<1x1x64xf32> to vector<1x64xf32>
      %68 = vector.shape_cast %65 : vector<1x64xf32> to vector<1x1x64xf32>
      tpu.vector_store %arg12[%c0_50, %c0_51, %c0_52], %68 {strides = array<i32>} : memref<1x1x64xf32, #tpu.memory_space<vmem>>, vector<1x1x64xf32>,
    } else {
    }
    %c0_i32_2 = arith.constant 0 : i32
    %5 = arith.cmpi eq, %arg2, %c0_i32_2 : i32
    %6 = arith.extui %5 : i1 to i32
    %c0_i32_3 = arith.constant 0 : i32
    %7 = arith.cmpi ne, %6, %c0_i32_3 : i32
    scf.if %7 {
      %c0_42 = arith.constant 0 : index
      %c0_43 = arith.constant 0 : index
      %59 = vector.load %arg13[%c0_42, %c0_43] : memref<64x64xf32, #tpu.memory_space<vmem>>, vector<64x64xf32>
      %c0_44 = arith.constant 0 : index
      %c0_45 = arith.constant 0 : index
      %c0_46 = arith.constant 0 : index
      %60 = vector.load %arg5[%c0_44, %c0_45, %c0_46] : memref<1x64x8xf32, #tpu.memory_space<vmem>>, vector<1x64x8xf32>
      %61 = vector.shape_cast %60 : vector<1x64x8xf32> to vector<64x8xf32>
      %cst_47 = arith.constant dense<0.000000e+00> : vector<64x8xf32>
      %62 = tpu.matmul %59, %61, %cst_47 {dimension_numbers = #tpu.dot_dimension_numbers<[1], [0], [0], [1], [0, 0, 1, 1], [], []>} : vector<64x64xf32>, vector<64x8xf32>, vector<64x8xf32> -> vector<64x8xf32>
      %c0_48 = arith.constant 0 : index
      %c0_49 = arith.constant 0 : index
      %c0_50 = arith.constant 0 : index
      %63 = vector.load %arg8[%c0_48, %c0_49, %c0_50] : memref<1x1x8xf32, #tpu.memory_space<vmem>>, vector<1x1x8xf32>
      %64 = vector.shape_cast %63 : vector<1x1x8xf32> to vector<1x8xf32>
      %65 = vector.broadcast %64 : vector<1x8xf32> to vector<64x8xf32>
      %66 = arith.addf %62, %65 : vector<64x8xf32>
      %c0_51 = arith.constant 0 : index
      %c0_52 = arith.constant 0 : index
      %67 = vector.load %arg14[%c0_51, %c0_52] : memref<64x8xf32, #tpu.memory_space<vmem>>, vector<64x8xf32>
      tpu.vector_store %arg14[%c0_51, %c0_52], %66 {strides = array<i32>} : memref<64x8xf32, #tpu.memory_space<vmem>>, vector<64x8xf32>,
      %cst_53 = arith.constant 0xFF800000 : f32
      %68 = vector.broadcast %cst_53 : f32 to vector<64x1xf32>
      %c0_54 = arith.constant 0 : index
      %c0_55 = arith.constant 0 : index
      %69 = vector.load %arg15[%c0_54, %c0_55] : memref<64x1xf32, #tpu.memory_space<vmem>>, vector<64x1xf32>
      tpu.vector_store %arg15[%c0_54, %c0_55], %68 {strides = array<i32>} : memref<64x1xf32, #tpu.memory_space<vmem>>, vector<64x1xf32>,
      %cst_56 = arith.constant 0.000000e+00 : f32
      %70 = vector.broadcast %cst_56 : f32 to vector<64x1xf32>
      %c0_57 = arith.constant 0 : index
      %c0_58 = arith.constant 0 : index
      %71 = vector.load %arg16[%c0_57, %c0_58] : memref<64x1xf32, #tpu.memory_space<vmem>>, vector<64x1xf32>
      tpu.vector_store %arg16[%c0_57, %c0_58], %70 {strides = array<i32>} : memref<64x1xf32, #tpu.memory_space<vmem>>, vector<64x1xf32>,
      %cst_59 = arith.constant 0.000000e+00 : f32
      %72 = vector.broadcast %cst_59 : f32 to vector<64x8xf32>
      %c0_60 = arith.constant 0 : index
      %c0_61 = arith.constant 0 : index
      %73 = vector.load %arg17[%c0_60, %c0_61] : memref<64x8xf32, #tpu.memory_space<vmem>>, vector<64x8xf32>
      tpu.vector_store %arg17[%c0_60, %c0_61], %72 {strides = array<i32>} : memref<64x8xf32, #tpu.memory_space<vmem>>, vector<64x8xf32>,
    } else {
    }
    %c64_i32 = arith.constant 64 : i32
    %8 = arith.muli %arg2, %c64_i32 : i32
    %9 = tpu.assume_multiple %8, 64 : i32
    %10 = arith.index_cast %9 : i32 to index
    %c0 = arith.constant 0 : index
    %11 = vector.load %arg13[%10, %c0] : memref<64x64xf32, #tpu.memory_space<vmem>>, vector<64x64xf32>
    %c0_4 = arith.constant 0 : index
    %12 = arith.index_cast %9 : i32 to index
    %c0_5 = arith.constant 0 : index
    %13 = vector.load %arg3[%c0_4, %12, %c0_5] : memref<1x64x64xf32, #tpu.memory_space<vmem>>, vector<1x64x64xf32>
    %14 = vector.shape_cast %13 : vector<1x64x64xf32> to vector<64x64xf32>
    %c0_6 = arith.constant 0 : index
    %c0_7 = arith.constant 0 : index
    %c0_8 = arith.constant 0 : index
    %15 = vector.load %arg6[%c0_6, %c0_7, %c0_8] : memref<1x64x8xf32, #tpu.memory_space<vmem>>, vector<1x64x8xf32>
    %16 = vector.shape_cast %15 : vector<1x64x8xf32> to vector<64x8xf32>
    %cst = arith.constant dense<0.000000e+00> : vector<64x8xf32>
    %17 = tpu.matmul %11, %16, %cst {dimension_numbers = #tpu.dot_dimension_numbers<[1], [0], [0], [1], [0, 0, 1, 1], [], []>} : vector<64x64xf32>, vector<64x8xf32>, vector<64x8xf32> -> vector<64x8xf32>
    %c0_9 = arith.constant 0 : index
    %c0_10 = arith.constant 0 : index
    %c0_11 = arith.constant 0 : index
    %18 = vector.load %arg9[%c0_9, %c0_10, %c0_11] : memref<1x1x8xf32, #tpu.memory_space<vmem>>, vector<1x1x8xf32>
    %19 = vector.shape_cast %18 : vector<1x1x8xf32> to vector<1x8xf32>
    %20 = vector.broadcast %19 : vector<1x8xf32> to vector<64x8xf32>
    %21 = arith.addf %17, %20 : vector<64x8xf32>
    %c0_12 = arith.constant 0 : index
    %c0_13 = arith.constant 0 : index
    %c0_14 = arith.constant 0 : index
    %22 = vector.load %arg7[%c0_12, %c0_13, %c0_14] : memref<1x64x8xf32, #tpu.memory_space<vmem>>, vector<1x64x8xf32>
    %23 = vector.shape_cast %22 : vector<1x64x8xf32> to vector<64x8xf32>
    %cst_15 = arith.constant dense<0.000000e+00> : vector<64x8xf32>
    %24 = tpu.matmul %14, %23, %cst_15 {dimension_numbers = #tpu.dot_dimension_numbers<[1], [0], [0], [1], [0, 0, 1, 1], [], []>} : vector<64x64xf32>, vector<64x8xf32>, vector<64x8xf32> -> vector<64x8xf32>
    %c0_16 = arith.constant 0 : index
    %c0_17 = arith.constant 0 : index
    %c0_18 = arith.constant 0 : index
    %25 = vector.load %arg10[%c0_16, %c0_17, %c0_18] : memref<1x1x8xf32, #tpu.memory_space<vmem>>, vector<1x1x8xf32>
    %26 = vector.shape_cast %25 : vector<1x1x8xf32> to vector<1x8xf32>
    %27 = vector.broadcast %26 : vector<1x8xf32> to vector<64x8xf32>
    %28 = arith.addf %24, %27 : vector<64x8xf32>
    %c0_19 = arith.constant 0 : index
    %c0_20 = arith.constant 0 : index
    %29 = vector.load %arg14[%c0_19, %c0_20] : memref<64x8xf32, #tpu.memory_space<vmem>>, vector<64x8xf32>
    %cst_21 = arith.constant dense<0.000000e+00> : vector<64x64xf32>
    %30 = tpu.matmul %29, %21, %cst_21 {dimension_numbers = #tpu.dot_dimension_numbers<[1], [1], [0], [0], [0, 0, 1, 0], [], []>} : vector<64x8xf32>, vector<64x8xf32>, vector<64x64xf32> -> vector<64x64xf32>
    %cst_22 = arith.constant 0.353553385 : f32
    %31 = vector.broadcast %cst_22 : f32 to vector<64x64xf32>
    %32 = arith.mulf %30, %31 : vector<64x64xf32>
    %c0_23 = arith.constant 0 : index
    %c0_24 = arith.constant 0 : index
    %33 = vector.load %arg15[%c0_23, %c0_24] : memref<64x1xf32, #tpu.memory_space<vmem>>, vector<64x1xf32>
    %cst_25 = arith.constant dense<0xFF800000> : vector<64xf32>
    %34 = vector.multi_reduction <maximumf>, %32, %cst_25 [1] : vector<64x64xf32> to vector<64xf32>
    %35 = vector.shape_cast %34 : vector<64xf32> to vector<64x1xf32>
    %36 = arith.maximumf %33, %35 : vector<64x1xf32>
    %c0_26 = arith.constant 0 : index
    %c0_27 = arith.constant 0 : index
    %37 = vector.load %arg15[%c0_26, %c0_27] : memref<64x1xf32, #tpu.memory_space<vmem>>, vector<64x1xf32>
    %38 = arith.subf %37, %36 : vector<64x1xf32>
    %39 = math.exp %38 : vector<64x1xf32>
    %40 = vector.broadcast %36 : vector<64x1xf32> to vector<64x64xf32>
    %41 = arith.subf %32, %40 : vector<64x64xf32>
    %42 = math.exp %41 : vector<64x64xf32>
    %c0_28 = arith.constant 0 : index
    %c0_29 = arith.constant 0 : index
    %43 = vector.load %arg16[%c0_28, %c0_29] : memref<64x1xf32, #tpu.memory_space<vmem>>, vector<64x1xf32>
    %44 = arith.mulf %39, %43 : vector<64x1xf32>
    %cst_30 = arith.constant dense<0.000000e+00> : vector<64xf32>
    %45 = vector.multi_reduction <add>, %42, %cst_30 [1] : vector<64x64xf32> to vector<64xf32>
    %46 = vector.shape_cast %45 : vector<64xf32> to vector<64x1xf32>
    %47 = arith.addf %44, %46 : vector<64x1xf32>
    %c0_31 = arith.constant 0 : index
    %c0_32 = arith.constant 0 : index
    %48 = vector.load %arg16[%c0_31, %c0_32] : memref<64x1xf32, #tpu.memory_space<vmem>>, vector<64x1xf32>
    tpu.vector_store %arg16[%c0_31, %c0_32], %47 {strides = array<i32>} : memref<64x1xf32, #tpu.memory_space<vmem>>, vector<64x1xf32>,
    %c0_33 = arith.constant 0 : index
    %c0_34 = arith.constant 0 : index
    %49 = vector.load %arg17[%c0_33, %c0_34] : memref<64x8xf32, #tpu.memory_space<vmem>>, vector<64x8xf32>
    %50 = vector.broadcast %39 : vector<64x1xf32> to vector<64x8xf32>
    %51 = arith.mulf %50, %49 : vector<64x8xf32>
    %cst_35 = arith.constant dense<0.000000e+00> : vector<64x8xf32>
    %52 = tpu.matmul %42, %28, %cst_35 {dimension_numbers = #tpu.dot_dimension_numbers<[1], [0], [0], [1], [0, 0, 1, 1], [], []>} : vector<64x64xf32>, vector<64x8xf32>, vector<64x8xf32> -> vector<64x8xf32>
    %53 = arith.addf %51, %52 : vector<64x8xf32>
    %c0_36 = arith.constant 0 : index
    %c0_37 = arith.constant 0 : index
    %54 = vector.load %arg17[%c0_36, %c0_37] : memref<64x8xf32, #tpu.memory_space<vmem>>, vector<64x8xf32>
    tpu.vector_store %arg17[%c0_36, %c0_37], %53 {strides = array<i32>} : memref<64x8xf32, #tpu.memory_space<vmem>>, vector<64x8xf32>,
    %c0_38 = arith.constant 0 : index
    %c0_39 = arith.constant 0 : index
    %55 = vector.load %arg15[%c0_38, %c0_39] : memref<64x1xf32, #tpu.memory_space<vmem>>, vector<64x1xf32>
    tpu.vector_store %arg15[%c0_38, %c0_39], %36 {strides = array<i32>} : memref<64x1xf32, #tpu.memory_space<vmem>>, vector<64x1xf32>,
    %c0_i32_40 = arith.constant 0 : i32
    %56 = arith.cmpi eq, %arg2, %c0_i32_40 : i32
    %57 = arith.extui %56 : i1 to i32
    %c0_i32_41 = arith.constant 0 : i32
    %58 = arith.cmpi ne, %57, %c0_i32_41 : i32
    scf.if %58 {
      %c0_42 = arith.constant 0 : index
      %c0_43 = arith.constant 0 : index
      %59 = vector.load %arg16[%c0_42, %c0_43] : memref<64x1xf32, #tpu.memory_space<vmem>>, vector<64x1xf32>
      %cst_44 = arith.constant 1.000000e+00 : f32
      %60 = vector.broadcast %cst_44 : f32 to vector<64x1xf32>
      %61 = arith.divf %60, %59 : vector<64x1xf32>
      %c0_45 = arith.constant 0 : index
      %c0_46 = arith.constant 0 : index
      %62 = vector.load %arg17[%c0_45, %c0_46] : memref<64x8xf32, #tpu.memory_space<vmem>>, vector<64x8xf32>
      %63 = vector.broadcast %61 : vector<64x1xf32> to vector<64x8xf32>
      %64 = arith.mulf %62, %63 : vector<64x8xf32>
      %c0_47 = arith.constant 0 : index
      %c0_48 = arith.constant 0 : index
      %c0_49 = arith.constant 0 : index
      %c0_50 = arith.constant 0 : index
      %65 = vector.load %arg11[%c0_47, %c0_48, %c0_49, %c0_50] : memref<1x1x64x8xf32, #tpu.memory_space<vmem>>, vector<1x1x64x8xf32>
      %66 = vector.shape_cast %65 : vector<1x1x64x8xf32> to vector<64x8xf32>
      %67 = vector.shape_cast %64 : vector<64x8xf32> to vector<1x1x64x8xf32>
      tpu.vector_store %arg11[%c0_47, %c0_48, %c0_49, %c0_50], %67 {strides = array<i32>} : memref<1x1x64x8xf32, #tpu.memory_space<vmem>>, vector<1x1x64x8xf32>,
    } else {
    }
    return
  }
  func.func @transform_0(%arg0: i32, %arg1: i32, %arg2: i32) -> (i32, i32, i32) {
    %c0_i32 = arith.constant 0 : i32
    %c0_i32_0 = arith.constant 0 : i32
    %c0_i32_1 = arith.constant 0 : i32
    return %arg0, %c0_i32, %c0_i32_0 : i32, i32, i32
  }
  func.func @transform_1(%arg0: i32, %arg1: i32, %arg2: i32) -> (i32, i32) {
    %c0_i32 = arith.constant 0 : i32
    %c0_i32_0 = arith.constant 0 : i32
    %c0_i32_1 = arith.constant 0 : i32
    return %c0_i32, %c0_i32_0 : i32, i32
  }
  func.func @transform_2(%arg0: i32, %arg1: i32, %arg2: i32) -> (i32, i32, i32) {
    %c0_i32 = arith.constant 0 : i32
    %c0_i32_0 = arith.constant 0 : i32
    %c0_i32_1 = arith.constant 0 : i32
    return %arg1, %c0_i32, %c0_i32_0 : i32, i32, i32
  }
  func.func @transform_3(%arg0: i32, %arg1: i32, %arg2: i32) -> (i32, i32, i32) {
    %c0_i32 = arith.constant 0 : i32
    %c0_i32_0 = arith.constant 0 : i32
    %c0_i32_1 = arith.constant 0 : i32
    return %arg1, %c0_i32, %c0_i32_0 : i32, i32, i32
  }
  func.func @transform_4(%arg0: i32, %arg1: i32, %arg2: i32) -> (i32, i32, i32) {
    %c0_i32 = arith.constant 0 : i32
    %c0_i32_0 = arith.constant 0 : i32
    %c0_i32_1 = arith.constant 0 : i32
    return %arg1, %c0_i32, %c0_i32_0 : i32, i32, i32
  }
  func.func @transform_5(%arg0: i32, %arg1: i32, %arg2: i32) -> (i32, i32, i32) {
    %c0_i32 = arith.constant 0 : i32
    %c0_i32_0 = arith.constant 0 : i32
    %c0_i32_1 = arith.constant 0 : i32
    return %arg1, %c0_i32, %c0_i32_0 : i32, i32, i32
  }
  func.func @transform_6(%arg0: i32, %arg1: i32, %arg2: i32) -> (i32, i32, i32) {
    %c0_i32 = arith.constant 0 : i32
    %c0_i32_0 = arith.constant 0 : i32
    %c0_i32_1 = arith.constant 0 : i32
    return %arg1, %c0_i32, %c0_i32_0 : i32, i32, i32
  }
  func.func @transform_7(%arg0: i32, %arg1: i32, %arg2: i32) -> (i32, i32, i32) {
    %c0_i32 = arith.constant 0 : i32
    %c0_i32_0 = arith.constant 0 : i32
    %c0_i32_1 = arith.constant 0 : i32
    return %arg1, %c0_i32, %c0_i32_0 : i32, i32, i32
  }
  func.func @transform_8(%arg0: i32, %arg1: i32, %arg2: i32) -> (i32, i32, i32, i32) {
    %c0_i32 = arith.constant 0 : i32
    %c0_i32_0 = arith.constant 0 : i32
    %c0_i32_1 = arith.constant 0 : i32
    return %arg0, %arg1, %c0_i32, %c0_i32_0 : i32, i32, i32, i32
  }
  func.func @transform_9(%arg0: i32, %arg1: i32, %arg2: i32) -> (i32, i32, i32) {
    %c0_i32 = arith.constant 0 : i32
    %c0_i32_0 = arith.constant 0 : i32
    %c0_i32_1 = arith.constant 0 : i32
    return %arg0, %c0_i32, %c0_i32_0 : i32, i32, i32
  }
}

</mosaic_0001>

<bundles_post_ra>
// kernel: tpu_custom_call.1
= control target key start
LH: loop header
LB: loop body
LE: loop exit
PB: predicated region body
PF: predicated region fallthrough
CT: control target
= control target key end

     0   :  { %s3005_s0 = inlined_call_operand.vmem [shape: f32[2,64,64], index: 0, kind: input, shape index: {}]   ;;  %s3006_s1 = inlined_call_operand.vmem [shape: f32[64,64], index: 1, kind: input, shape index: {}]   ;;  %s3007_s2 = inlined_call_operand.vmem [shape: f32[8,64,8], index: 2, kind: input, shape index: {}]   ;;  %s3008_s3 = inlined_call_operand.vmem [shape: f32[8,64,8], index: 3, kind: input, shape index: {}]   ;;  %s3009_s4 = inlined_call_operand.vmem [shape: f32[8,64,8], index: 4, kind: input, shape index: {}]   ;;  %s3010_s5 = inlined_call_operand.vmem [shape: f32[8,1,8], index: 5, kind: input, shape index: {}]   ;;  %s3011_s6 = inlined_call_operand.vmem [shape: f32[8,1,8], index: 6, kind: input, shape index: {}]   ;;  %s3012_s7 = inlined_call_operand.vmem [shape: f32[8,1,8], index: 7, kind: input, shape index: {}]   ;;  %s3013_s8 = inlined_call_operand.vmem [shape: f32[2,8,64,8], index: 8, kind: output, shape index: {0}]   ;;  %s3014_s9 = inlined_call_operand.hbm [shape: f32[2,1,64], index: 9, kind: output, shape index: {1}]  }
   0x1   :  { %3027 = sst [smem:[#allocation21_spill]] %s3005_s0 }
   0x2   :  { %3028 = sst [smem:[#allocation22_spill]] %s3007_s2 }
   0x3   :  { %3029 = sst [smem:[#allocation23_spill]] %s3008_s3 }
   0x4   :  { %3030 = sst [smem:[#allocation24_spill]] %s3014_s9 }
   0x5   :  { %15 = vsyncpa [#allocation8], 0 }
   0x6   :  { %17 = vsyncpa [#allocation8 + $0x1], 0  ;;  %s2459_s30 = smov 0   ;;  %s2461_s10 = smov 0  }
   0x7   :  { %s2463_s11 = smov 0   ;;  %s2465_s12 = smov 0  }
   0x8   :  { %s2467_s13 = smov 0   ;;  %s2469_s14 = smov 0  }
   0x9   :  { %s2471_s15 = smov 0   ;;  %s2473_s16 = smov 0  }
   0xa LB: > { %3031 = sst [smem:[#allocation10_spill]] %s2375_s30  ;;  %s1891_s17 = sadd.s32 4294967295, %s2403_s16   ;;  %s2403_s16 = sphi %s2473_s16, %s23_s16   ;;  %s2399_s15 = sphi %s2471_s15, %s3061_s15   ;;  %s2395_s14 = sphi %s2469_s14, %s3060_s14   ;;  %s2391_s13 = sphi %s2467_s13, %s3059_s13   ;;  %s2387_s12 = sphi %s2465_s12, %s3058_s12   ;;  %s2383_s11 = sphi %s2463_s11, %s3057_s11   ;;  %s2379_s10 = sphi %s2461_s10, %s3063_s10   ;;  %s2375_s30 = sphi %s2459_s30, %s3062_s30  }
   0xb   : > { %3032 = sst [smem:[#allocation11_spill]] %s2383_s11  ;;  %s1892_s18 = sadd.s32 4294967294, %s2403_s16  }
   0xc   : > { %3033 = sst [smem:[#allocation12_spill]] %s2391_s13  ;;  %s38_s19 = sadd.s32 1, %s2395_s14 }
   0xd   : > { %3034 = sst [smem:[#allocation13_spill]] %s2395_s14  ;;  %p40_p0 = scmp.ge.s32.totalorder %s38_s19, 8 }
   0xe   : > { %3035 = sst [smem:[#allocation14_spill]] %s2399_s15  ;;  %s42_s20 = sadd.s32 1, %s2399_s15 }
   0xf   : > { %3036 = sst [smem:[#allocation15_spill]] %s2403_s16  ;;  %p290_p1 = scmp.ne.s32.totalorder %s2383_s11, %s2379_s10 }
  0x10   : > { %p291_p2 = scmp.eq.s32.totalorder %s1891_s17, 15  ;;  %s3065_s19 = smov (%p40_p0, %s38_s19), 0 }
  0x11   : > { %3037 = sst [smem:[#allocation16_spill]] %s3065_s19  ;;  %s3067_s20 = smov (!%p40_p0, %s42_s20), %s2399_s15 }
  0x12   : > { %p2508_p3 = por %p291_p2, %p290_p1  ;;  %p296_p4 = scmp.ne.s32.totalorder %s2379_s10, %s2375_s30 }
  0x13   : > { %p44_p5 = scmp.ge.s32.totalorder %s3067_s20, 2  ;;  %p297_p6 = scmp.eq.s32.totalorder %s1892_s18, 15 }
  0x14   : > { %s3038_s21 = scalar_select %p2508_p3, 1, 0 }
  0x15   : > { %p1895_p7 = scmp.ge.s32.totalorder %s2403_s16, 1  ;;  %p368_p8 = scmp.lt.s32.totalorder %s2403_s16, 17 }
  0x16   : > { %3039 = sst [smem:[#allocation17_spill]] %s3038_s21  ;;  %s3069_s20 = smov (%p44_p5, %s3067_s20), 0 }
  0x17   : > { %3040 = sst [smem:[#allocation18_spill]] %s3069_s20  ;;  %p2518_p9 = por %p297_p6, %p296_p4 }
  0x18   : > { %p369_p10 = pnand %p1895_p7, %p368_p8  ;;  %s277_s23 = ssub.s32 %s2399_s15, %s3069_s20 }
  0x19   : > { %s3041_s22 = scalar_select %p2518_p9, 1, 0 }
  0x1a   : > { %s280_s24 = sadd.s32 1, %s2383_s11  ;;  %p278_p11 = scmp.eq.s32.totalorder %s277_s23, 0 }
  0x1b   : > { %3042 = sst [smem:[#allocation19_spill]] %s3041_s22  ;;  %372 = sbr.rel (%p369_p10) target bundleno = 1122 (0x462), region = 52 }
  0x1c   : > { %s2526_s25 = scalar_select %p278_p11, %s2383_s11, %s280_s24  }
  0x1d   : > { %p436_p12 = scmp.lt.s32.totalorder (!%p369_p10), %s2391_s13, 1  ;;  %p441_p13 = scmp.lt.s32.totalorder (!%p369_p10), %s2387_s12, 7 }
  0x1e   : > { %3043 = sst [smem:[#allocation20_spill]] %s2526_s25  ;;  %p474_p0 = scmp.eq.s32.totalorder (!%p369_p10), %s2387_s12, 0 }
  0x1f   : > { %s3044_s0 = sld [smem:[#allocation21_spill]] (!%p369_p10)  ;;  %s3047_s22 = sand.u32 (!%p369_p10), 1, %s2379_s10  }
  0x20   : > { %s437_s27 = scalar_select %p436_p12, %s2391_s13, 1  ;;  %v488_v1 = vld [vmem:[%s3006_s1] sm:$0xff] (%p474_p0)  ;;  %vm504_vm0 = vcmask (%p474_p0), 523264   ;;  %v489_v5 = vld [vmem:[%s3006_s1 + $0x8] sm:$0xff] (%p474_p0)  ;;  %v490_v8 = vld [vmem:[%s3006_s1 + $0x10] sm:$0xff] (%p474_p0)  ;;  %vm534_vm1 = vcmask (%p474_p0), 516096  }
  0x21   : > { %s2533_s28 = scalar_select %p441_p13, %s2387_s12, 7  ;;  %v491_v14 = vld [vmem:[%s3006_s1 + $0x18] sm:$0xff] (%p474_p0)  ;;  %v492_v18 = vld [vmem:[%s3006_s1 + $0x20] sm:$0xff] (%p474_p0)  ;;  %v493_v20 = vld [vmem:[%s3006_s1 + $0x28] sm:$0xff] (%p474_p0) }
  0x22   : > { %s1962_s29 = sshll.u32 %s437_s27, 6  ;;  %s3045_s2 = sld [smem:[#allocation22_spill]]  ;;  %v494_v25 = vld [vmem:[%s3006_s1 + $0x30] sm:$0xff] (%p474_p0)  ;;  %v495_v29 = vld [vmem:[%s3006_s1 + $0x38] sm:$0xff] (%p474_p0) }
  0x23   : > { %s1963_s24 = sshll.u32 %s2533_s28, 6  ;;  %s3046_s3 = sld [smem:[#allocation23_spill]] }
  0x24   : > { %s2555_s27 = scalar_lea.vmem %s3009_s4, %s1963_s24  ;;  %s458_s18 = scalar_lea.vmem %s3010_s5, %s2533_s28 }
  0x25   : > { %s2539_s23 = scalar_lea.vmem %s3044_s0, %s1962_s29  ;;  %s461_s20 = scalar_lea.vmem %s3011_s6, %s2533_s28 }
  0x26   : > { %s464_s9 = scalar_lea.vmem %s3012_s7, %s2533_s28  ;;  %s1904_s14 = sshll.u32 %s2533_s28, 3  ;;  %v480_v0 = vld [vmem:[%s2539_s23] sm:$0xff] (%p474_p0)  ;;  %v481_v2 = vld [vmem:[%s2539_s23 + $0x8] sm:$0xff] (%p474_p0)  ;;  %v482_v7 = vld [vmem:[%s2539_s23 + $0x10] sm:$0xff] (%p474_p0) }
  0x27   : > { %s471_s15 = sadd.s32 %s1962_s29, %s1904_s14  ;;  %479 = sbr.rel (!%p474_p0) target bundleno = 67 (0x43), region = 56  ;;  %v496_v3 = vadd.f32 (%p474_p0), %v488_v1, %v480_v0  ;;  %v513_v4 = vsel (%p474_p0), %vm504_vm0, %v480_v0, 0.0  ;;  %v514_v6 = vsel (%p474_p0), %vm504_vm0, %v481_v2, 0.0  ;;  %v497_v9 = vadd.f32 (%p474_p0), %v489_v5, %v481_v2  ;;  %v483_v13 = vld [vmem:[%s2539_s23 + $0x18] sm:$0xff] (%p474_p0)  ;;  %v484_v15 = vld [vmem:[%s2539_s23 + $0x20] sm:$0xff] (%p474_p0)  ;;  %v485_v19 = vld [vmem:[%s2539_s23 + $0x28] sm:$0xff] (%p474_p0) }
  0x28   : > { %s2545_s19 = scalar_lea.vmem %s3045_s2, %s1963_s24  ;;  %v515_v10 = vadd.f32 (%p474_p0), %v514_v6, %v513_v4  ;;  %v498_v11 = vadd.f32 (%p474_p0), %v490_v8, %v482_v7  ;;  %v516_v12 = vsel (%p474_p0), %vm504_vm0, %v482_v7, 0.0  ;;  %v499_v16 = vadd.f32 (%p474_p0), %v491_v14, %v483_v13  ;;  %v486_v24 = vld [vmem:[%s2539_s23 + $0x30] sm:$0xff] (%p474_p0)  ;;  %v487_v28 = vld [vmem:[%s2539_s23 + $0x38] sm:$0xff] (%p474_p0) }
  0x29   : > { %s2550_s25 = scalar_lea.vmem %s3046_s3, %s1963_s24  ;;  %s1906_s3 = sshll.u32 %s471_s15, 3  ;;  %505 = vst.msk [vmem:[#allocation2] sm:$0xff] (%p474_p0), %vm504_vm0, %v496_v3  ;;  %v518_v17 = vsel (%p474_p0), %vm504_vm0, %v483_v13, 0.0  ;;  %506 = vst.msk [vmem:[#allocation2 + $0x8] sm:$0xff] (%p474_p0), %vm504_vm0, %v497_v9  ;;  %v500_v22 = vadd.f32 (%p474_p0), %v492_v18, %v484_v15  ;;  %v501_v23 = vadd.f32 (%p474_p0), %v493_v20, %v485_v19  ;;  %v520_v26 = vsel (%p474_p0), %vm504_vm0, %v484_v15, 0.0 }
  0x2a   : > { %s2573_s11 = scalar_lea.vmem %s3013_s8, %s1906_s3  ;;  %s2577_s24 = scalar_lea.vmem [#allocation7], %s3047_s22  ;;  %507 = vst.msk [vmem:[#allocation2 + $0x10] sm:$0xff] (%p474_p0), %vm504_vm0, %v498_v11  ;;  %v517_v21 = vadd.f32 (%p474_p0), %v516_v12, %v515_v10  ;;  %508 = vst.msk [vmem:[#allocation2 + $0x18] sm:$0xff] (%p474_p0), %vm504_vm0, %v499_v16  ;;  %v502_v27 = vadd.f32 (%p474_p0), %v494_v25, %v486_v24  ;;  %v503_v31 = vadd.f32 (%p474_p0), %v495_v29, %v487_v28  ;;  %v522_v32 = vsel (%p474_p0), %vm504_vm0, %v485_v19, 0.0 }
  0x2b   : > { %509 = vst.msk [vmem:[#allocation2 + $0x20] sm:$0xff] (%p474_p0), %vm504_vm0, %v500_v22  ;;  %510 = vst.msk [vmem:[#allocation2 + $0x28] sm:$0xff] (%p474_p0), %vm504_vm0, %v501_v23  ;;  %v524_v34 = vsel (%p474_p0), %vm504_vm0, %v486_v24, 0.0  ;;  %v526_v36 = vsel (%p474_p0), %vm504_vm0, %v487_v28, 0.0 }
  0x2c   : > { %v519_v30 = vadd.f32 %v518_v17, %v517_v21  ;;  %511 = vst.msk [vmem:[#allocation2 + $0x30] sm:$0xff] %vm504_vm0, %v502_v27  ;;  %512 = vst.msk [vmem:[#allocation2 + $0x38] sm:$0xff] %vm504_vm0, %v503_v31 }
  0x2e   : > { %v521_v33 = vadd.f32 %v520_v26, %v519_v30 }
  0x30   : > { %v523_v35 = vadd.f32 %v522_v32, %v521_v33 }
  0x32   : > { %v525_v37 = vadd.f32 %v524_v34, %v523_v35 }
  0x34   : > { %v527_v38 = vadd.f32 %v526_v36, %v525_v37 }
  0x36   : > { %v528_v39 = vrot.slane %v527_v38, 4 }
  0x38   : > { %v529_v40 = vadd.f32 %v528_v39, %v527_v38 }
  0x3a   : > { %v530_v41 = vrot.slane %v529_v40, 2 }
  0x3c   : > { %v531_v42 = vadd.f32 %v530_v41, %v529_v40 }
  0x3e   : > { %v532_v43 = vrot.slane %v531_v42, 1 }
  0x40   : > { %v533_v44 = vadd.f32 %v532_v43, %v531_v42 }
  0x42   : > { %535 = vst.msk [vmem:[%s2577_s24] sm:$0x1] %vm534_vm1, %v533_v44 }
  0x43 PF: > { %v752_v45 = vld [vmem:[%s2550_s25 + $0x38] sm:$0xff]  ;;  %v751_v46 = vld [vmem:[%s2550_s25 + $0x30] sm:$0xff]  ;;  %vm562_vm2 = vcmask 523264   ;;  %v750_v47 = vld [vmem:[%s2550_s25 + $0x28] sm:$0xff]  ;;  %vm692_vm3 = vcmask 64512   ;;  %vm701_vm4 = vcmask 7168  }
  0x44   : > { %2075 = vmatprep.subr.mxu1 %v752_v45  ;;  %v749_v49 = vld [vmem:[%s2550_s25 + $0x20] sm:$0xff]  ;;  %v554_v50 = vld [vmem:[%s2545_s19 + $0x38] sm:$0xff]  ;;  %v553_v51 = vld [vmem:[%s2545_s19 + $0x30] sm:$0xff]  ;;  %s3050_s16 = sld [smem:[#allocation24_spill]]  ;;  %s3052_s17 = sand.u32 1, %s2379_s10  }
  0x45   : > { %2076 = vmatpush3.msra.mxu1 %v752_v45  ;;  %v748_v52 = vld [vmem:[%s2550_s25 + $0x18] sm:$0xff]  ;;  %2047 = vmatprep.subr.mxu0 %v554_v50  ;;  %v552_v53 = vld [vmem:[%s2545_s19 + $0x28] sm:$0xff]  ;;  %v747_v54 = vld [vmem:[%s2550_s25 + $0x10] sm:$0xff]  ;;  %s1699_s26 = scalar_lea.sflag [#allocation8], %s3052_s17  ;;  %s2408_s15 = smov [#allocation7]  }
  0x46   : > { %2077 = vmatprep.subr.mxu1 %v751_v46  ;;  %2048 = vmatpush3.msra.mxu0 %v554_v50  ;;  %v551_v55 = vld [vmem:[%s2545_s19 + $0x20] sm:$0xff]  ;;  %v746_v56 = vld [vmem:[%s2550_s25 + $0x8] sm:$0xff]  ;;  %v550_v57 = vld [vmem:[%s2545_s19 + $0x18] sm:$0xff]  ;;  %s2315_s22 = sshll.u32 %s2408_s15, 4  ;;  %s2316_s22 = int_to_ptr.vmem [resolvable:$false] %s2315_s22 }
  0x47   : > { %v728_v48 = vld [vmem:[#allocation2] sm:$0xff]  ;;  %2078 = vmatpush3.msra.mxu1 %v751_v46  ;;  %2049 = vmatprep.subr.mxu0 %v553_v51  ;;  %v549_v59 = vld [vmem:[%s2545_s19 + $0x10] sm:$0xff]  ;;  %v729_v60 = vld [vmem:[#allocation2 + $0x8] sm:$0xff]  ;;  %s2317_s0 = scalar_lea.vmem %s2316_s22, 32 }
  0x48   : > { %2091 = vmatprep.mubr.msk.f32.mxu1 %vm562_vm2, %v728_v48  ;;  %2063 = vmatprep.mubr.msk.f32.mxu0 %vm562_vm2, %v728_v48  ;;  %v745_v58 = vld [vmem:[%s2550_s25] sm:$0xff]  ;;  %v730_v61 = vld [vmem:[#allocation2 + $0x10] sm:$0xff]  ;;  %v548_v62 = vld [vmem:[%s2545_s19 + $0x8] sm:$0xff] }
  0x49   : > { %2079 = vmatprep.subr.mxu1 %v750_v47  ;;  %2050 = vmatpush3.msra.mxu0 %v553_v51  ;;  %v547_v63 = vld [vmem:[%s2545_s19] sm:$0xff]  ;;  %v731_v0 = vld [vmem:[#allocation2 + $0x18] sm:$0xff]  ;;  %v733_v2 = vld [vmem:[#allocation2 + $0x28] sm:$0xff] }
  0x4a   : > { %2080 = vmatpush3.msra.mxu1 %v750_v47  ;;  %2051 = vmatprep.subr.mxu0 %v552_v53  ;;  %v732_v1 = vld [vmem:[#allocation2 + $0x20] sm:$0xff]  ;;  %v734_v3 = vld [vmem:[#allocation2 + $0x30] sm:$0xff]  ;;  %v735_v4 = vld [vmem:[#allocation2 + $0x38] sm:$0xff]  ;;  %s3051_s21 = smov %s3050_s16 }
  0x4b   : > { %2081 = vmatprep.subr.mxu1 %v749_v49  ;;  %2052 = vmatpush3.msra.mxu0 %v552_v53  ;;  %v1908_v7 = vld [vmem:[%s458_s18] ss:$0 sm:$0xff]  ;;  %v897_v47 = vld [vmem:[%s2555_s27 + $0x38] sm:$0xff]  ;;  %v896_v48 = vld [vmem:[%s2555_s27 + $0x30] sm:$0xff] }
  0x4c   : > { %2082 = vmatpush3.msra.mxu1 %v749_v49  ;;  %2053 = vmatprep.subr.mxu0 %v551_v55  ;;  %v1917_v19 = vld [vmem:[%s461_s20] ss:$0 sm:$0xff]  ;;  %v2405_v49 = vmov -inf   ;;  %v895_v50 = vld [vmem:[%s2555_s27 + $0x28] sm:$0xff]  ;;  %v893_v53 = vld [vmem:[%s2555_s27 + $0x18] sm:$0xff]  ;;  %s1714_s20 = sshll.u32 %s2577_s24, 4  ;;  %s1715_s20 = int_to_ptr.vmem [resolvable:$true] %s1714_s20 }
  0x4d   : > { %2083 = vmatprep.subr.mxu1 %v748_v52  ;;  %2054 = vmatpush3.msra.mxu0 %v551_v55  ;;  %702 = vst.msk [vmem:[#allocation4] sm:$0xff] %vm701_vm4, %v2405_v49  ;;  %703 = vst.msk [vmem:[#allocation4 + $0x8] sm:$0xff] %vm701_vm4, %v2405_v49  ;;  %v737_v51 = vld [vmem:[%s2539_s23] sm:$0xff]  ;;  %v891_v55 = vld [vmem:[%s2555_s27 + $0x8] sm:$0xff]  ;;  %s2311_s14 = scalar_lea.vmem %s1715_s20, 16  ;;  %p2318_p5 = scmp.lt.s32.totalorder %s1715_s20, %s2316_s22 }
  0x4e   : > { %2084 = vmatpush3.msra.mxu1 %v748_v52  ;;  %2055 = vmatprep.subr.mxu0 %v550_v57  ;;  %704 = vst.msk [vmem:[#allocation4 + $0x10] sm:$0xff] %vm701_vm4, %v2405_v49  ;;  %705 = vst.msk [vmem:[#allocation4 + $0x18] sm:$0xff] %vm701_vm4, %v2405_v49  ;;  %v894_v52 = vld [vmem:[%s2555_s27 + $0x20] sm:$0xff]  ;;  %p2312_p1 = scmp.ne.s32.totalorder %s1715_s20, %s2311_s14  ;;  %p2319_p6 = scmp.lt.s32.totalorder %s2317_s0, %s2311_s14 }
  0x4f   : > { %2085 = vmatprep.subr.mxu1 %v747_v54  ;;  %2056 = vmatpush3.msra.mxu0 %v550_v57  ;;  %706 = vst.msk [vmem:[#allocation4 + $0x20] sm:$0xff] %vm701_vm4, %v2405_v49  ;;  %707 = vst.msk [vmem:[#allocation4 + $0x28] sm:$0xff] %vm701_vm4, %v2405_v49  ;;  %v738_v57 = vld [vmem:[%s2539_s23 + $0x8] sm:$0xff] }
  0x50   : > { %2086 = vmatpush3.msra.mxu1 %v747_v54  ;;  %2057 = vmatprep.subr.mxu0 %v549_v59  ;;  %708 = vst.msk [vmem:[#allocation4 + $0x30] sm:$0xff] %vm701_vm4, %v2405_v49  ;;  %709 = vst.msk [vmem:[#allocation4 + $0x38] sm:$0xff] %vm701_vm4, %v2405_v49  ;;  %v892_v54 = vld [vmem:[%s2555_s27 + $0x10] sm:$0xff]  ;;  %p2313_p2 = pnand %p2312_p1, %p2508_p3  ;;  %p2320_p7 = por %p2319_p6, %p2318_p5 }
  0x51   : > { %2087 = vmatprep.subr.mxu1 %v746_v56  ;;  %2058 = vmatpush3.msra.mxu0 %v549_v59  ;;  %v740_v59 = vld [vmem:[%s2539_s23 + $0x18] sm:$0xff] }
  0x52   : > { %2088 = vmatpush3.msra.mxu1 %v746_v56  ;;  %2059 = vmatprep.subr.mxu0 %v548_v62  ;;  %v890_v56 = vld [vmem:[%s2555_s27] sm:$0xff]  ;;  %p2314_p4 = pneg %p2313_p2 }
  0x53   : > { %2089 = vmatprep.subr.mxu1 %v745_v58  ;;  %2060 = vmatpush3.msra.mxu0 %v548_v62  ;;  %v743_v62 = vld [vmem:[%s2539_s23 + $0x30] sm:$0xff] }
  0x54   : > { %2090 = vmatpush3.msra.mxu1 %v745_v58  ;;  %2061 = vmatprep.subr.mxu0 %v547_v63  ;;  %v739_v58 = vld [vmem:[%s2539_s23 + $0x10] sm:$0xff]  ;;  %p2321_p8 = pnand %p2320_p7, %p2314_p4 }
  0x55   : > { %2092 = vmatmul.mubr.msk.f32.vlgmr.msra.gmra.mxu1 %vm562_vm2, %v729_v60  ;;  %2062 = vmatpush3.msra.mxu0 %v547_v63  ;;  %v744_v63 = vld [vmem:[%s2539_s23 + $0x38] sm:$0xff] }
  0x56   : > { %2094 = vmatprep.mubr.msk.f32.mxu1 %vm562_vm2, %v730_v61  ;;  %2064 = vmatmul.mubr.msk.f32.vlgmr.msra.gmra.mxu0 %vm562_vm2, %v729_v60  ;;  %v741_v60 = vld [vmem:[%s2539_s23 + $0x20] sm:$0xff] }
  0x57   : > { %2066 = vmatprep.mubr.msk.f32.mxu0 %vm562_vm2, %v730_v61  ;;  %2103 = vmatprep.subr.mxu0 %v897_v47  ;;  %v742_v61 = vld [vmem:[%s2539_s23 + $0x28] sm:$0xff] }
  0x58   : > { %2104 = vmatpush3.msra.mxu0 %v897_v47  ;;  %v2813_v47 = vld [vmem:[#allocation4 + $0x20] sm:$0xff] }
  0x59   : > { %2095 = vmatmul.mubr.msk.f32.gmra.mxu1 %vm562_vm2, %v731_v0  ;;  %2105 = vmatprep.subr.mxu0 %v896_v48 }
  0x5a   : > { %2097 = vmatprep.mubr.msk.f32.mxu1 %vm562_vm2, %v732_v1  ;;  %2067 = vmatmul.mubr.msk.f32.gmra.mxu0 %vm562_vm2, %v731_v0 }
  0x5b   : > { %2069 = vmatprep.mubr.msk.f32.mxu0 %vm562_vm2, %v732_v1  ;;  %2106 = vmatpush3.msra.mxu0 %v896_v48 }
  0x5c   : > { %2107 = vmatprep.subr.mxu0 %v895_v50 }
  0x5d   : > { %2098 = vmatmul.mubr.msk.f32.gmra.mxu1 %vm562_vm2, %v733_v2  ;;  %2108 = vmatpush3.msra.mxu0 %v895_v50 }
  0x5e   : > { %2100 = vmatprep.mubr.msk.f32.mxu1 %vm562_vm2, %v734_v3  ;;  %2070 = vmatmul.mubr.msk.f32.gmra.mxu0 %vm562_vm2, %v733_v2 }
  0x5f   : > { %2072 = vmatprep.mubr.msk.f32.mxu0 %vm562_vm2, %v734_v3  ;;  %2109 = vmatprep.subr.mxu0 %v894_v52 }
  0x60   : > { %2110 = vmatpush3.msra.mxu0 %v894_v52 }
  0x61   : > { %2101 = vmatmul.mubr.msk.f32.gmra.mxu1 %vm562_vm2, %v735_v4  ;;  %2111 = vmatprep.subr.mxu0 %v893_v53 }
  0x62   : > { %2073 = vmatmul.mubr.msk.f32.gmra.mxu0 %vm562_vm2, %v735_v4 }
  0x63   : > { %2119 = vmatprep.mubr.msk.f32.mxu0 %vm562_vm2, %v737_v51  ;;  %2112 = vmatpush3.msra.mxu0 %v893_v53 }
  0x64   : > { %2113 = vmatprep.subr.mxu0 %v892_v54 }
  0x65   : > { %2114 = vmatpush3.msra.mxu0 %v892_v54 }
  0x66   : > { %2115 = vmatprep.subr.mxu0 %v891_v55 }
  0x67   : > { %2116 = vmatpush3.msra.mxu0 %v891_v55 }
  0x68   : > { %2117 = vmatprep.subr.mxu0 %v890_v56 }
  0x69   : > { %2118 = vmatpush3.msra.mxu0 %v890_v56 }
  0x6a   : > { %2120 = vmatmul.mubr.msk.f32.vlgmr.msra.gmra.mxu0 %vm562_vm2, %v738_v57  ;;  %v2830_v57 = vld [vmem:[#allocation4 + $0x28] sm:$0xff] }
  0x6b   : > { %2122 = vmatprep.mubr.msk.f32.mxu0 %vm562_vm2, %v739_v58  ;;  %v2832_v58 = vld [vmem:[#allocation4 + $0x30] sm:$0xff] }
  0x6e   : > { %2123 = vmatmul.mubr.msk.f32.gmra.mxu0 %vm562_vm2, %v740_v59 }
  0x6f   : > { %2125 = vmatprep.mubr.msk.f32.mxu0 %vm562_vm2, %v741_v60 }
  0x72   : > { %2126 = vmatmul.mubr.msk.f32.gmra.mxu0 %vm562_vm2, %v742_v61 }
  0x73   : > { %2128 = vmatprep.mubr.msk.f32.mxu0 %vm562_vm2, %v743_v62 }
  0x76   : > { %2129 = vmatmul.mubr.msk.f32.gmra.mxu0 %vm562_vm2, %v744_v63 }
 0x115   : > { %v2093_v5 = vpop.f32.mrf.mxu1 }
 0x116   : > { %v2065_v9 = vpop.f32.mrf.mxu0  ;;  %v857_v38 = vadd.f32 %v2093_v5, %v1917_v19 }
 0x117   : > { %v851_v6 = vpop.f32.mrf.mxu1  ;;  %v659_v11 = vadd.f32 %v2065_v9, %v1908_v7 }
 0x118   : > { %v653_v12 = vpop.f32.mrf.mxu0  ;;  %v852_v39 = vadd.f32 %v1917_v19, %v851_v6 }
 0x119   : > { %v2096_v8 = vpop.f32.mrf.mxu1  ;;  %694 = vst.msk [vmem:[#allocation3 + $0x8] sm:$0xff] %vm692_vm3, %v659_v11  ;;  %v654_v14 = vadd.f32 %v1908_v7, %v653_v12 }
 0x11a   : > { %v2068_v15 = vpop.f32.mrf.mxu0  ;;  %v867_v36 = vadd.f32 %v2096_v8, %v1917_v19 }
 0x11b   : > { %v861_v10 = vpop.f32.mrf.mxu1  ;;  %693 = vst.msk [vmem:[#allocation3] sm:$0xff] %vm692_vm3, %v654_v14  ;;  %v669_v17 = vadd.f32 %v2068_v15, %v1908_v7 }
 0x11c   : > { %v663_v18 = vpop.f32.mrf.mxu0  ;;  %v862_v37 = vadd.f32 %v1917_v19, %v861_v10 }
 0x11d   : > { %v2099_v13 = vpop.f32.mrf.mxu1  ;;  %696 = vst.msk [vmem:[#allocation3 + $0x18] sm:$0xff] %vm692_vm3, %v669_v17  ;;  %v664_v21 = vadd.f32 %v1908_v7, %v663_v18 }
 0x11e   : > { %v2071_v23 = vpop.f32.mrf.mxu0  ;;  %v877_v32 = vadd.f32 %v2099_v13, %v1917_v19 }
 0x11f   : > { %v871_v16 = vpop.f32.mrf.mxu1  ;;  %695 = vst.msk [vmem:[#allocation3 + $0x10] sm:$0xff] %vm692_vm3, %v664_v21  ;;  %v679_v25 = vadd.f32 %v2071_v23, %v1908_v7  ;;  %v2406_v23 = vmov 0  }
 0x120   : > { %v673_v27 = vpop.f32.mrf.mxu0  ;;  %v872_v35 = vadd.f32 %v1917_v19, %v871_v16  ;;  %v1035_v41 = vld [vmem:[#allocation3 + $0x8] sm:$0xff]  ;;  %2261 = vset.pattern.permute.xlu0 %v2406_v23  ;;  %2262 = vset.pattern.permute.xlu1 %v2406_v23 }
 0x121   : > { %v2102_v20 = vpop.f32.mrf.mxu1  ;;  %698 = vst.msk [vmem:[#allocation3 + $0x28] sm:$0xff] %vm692_vm3, %v679_v25  ;;  %v674_v28 = vadd.f32 %v1908_v7, %v673_v27  ;;  %v2407_v25 = vmov 0.0  }
 0x122   : > { %v887_v22 = vadd.f32 %v2102_v20, %v1917_v19  ;;  %v1034_v29 = vld [vmem:[#allocation3] sm:$0xff]  ;;  %v2074_v30 = vpop.f32.mrf.mxu0  ;;  %710 = vst.msk [vmem:[#allocation5] sm:$0xff] %vm701_vm4, %v2407_v25  ;;  %711 = vst.msk [vmem:[#allocation5 + $0x8] sm:$0xff] %vm701_vm4, %v2407_v25 }
 0x123   : > { %v881_v24 = vpop.f32.mrf.mxu1  ;;  %2147 = vmatprep.mubr.msk.f32.mxu1 %vm692_vm3, %v1034_v29  ;;  %697 = vst.msk [vmem:[#allocation3 + $0x20] sm:$0xff] %vm692_vm3, %v674_v28  ;;  %v689_v31 = vadd.f32 %v2074_v30, %v1908_v7  ;;  %718 = vst.msk [vmem:[#allocation6] sm:$0xff] %vm692_vm3, %v2407_v25 }
 0x124   : > { %v882_v26 = vadd.f32 %v1917_v19, %v881_v24  ;;  %2131 = vmatprep.subr.msk.mxu1 %vm692_vm3, %v887_v22  ;;  %v683_v33 = vpop.f32.mrf.mxu0  ;;  %v1037_v43 = vld [vmem:[#allocation3 + $0x18] sm:$0xff]  ;;  %712 = vst.msk [vmem:[#allocation5 + $0x10] sm:$0xff] %vm701_vm4, %v2407_v25  ;;  %713 = vst.msk [vmem:[#allocation5 + $0x18] sm:$0xff] %vm701_vm4, %v2407_v25 }
 0x125   : > { %2132 = vmatpush3.xpose.msk.msra.mxu1 %vm692_vm3, %v887_v22  ;;  %700 = vst.msk [vmem:[#allocation3 + $0x38] sm:$0xff] %vm692_vm3, %v689_v31  ;;  %v684_v34 = vadd.f32 %v1908_v7, %v683_v33  ;;  %719 = vst.msk [vmem:[#allocation6 + $0x8] sm:$0xff] %vm692_vm3, %v2407_v25  ;;  %v2786_v31 = vld [vmem:[#allocation4] sm:$0xff] }
 0x126   : > { %2133 = vmatprep.subr.msk.mxu1 %vm692_vm3, %v882_v26  ;;  %v1036_v40 = vld [vmem:[#allocation3 + $0x10] sm:$0xff]  ;;  %714 = vst.msk [vmem:[#allocation5 + $0x20] sm:$0xff] %vm701_vm4, %v2407_v25  ;;  %715 = vst.msk [vmem:[#allocation5 + $0x28] sm:$0xff] %vm701_vm4, %v2407_v25 }
 0x127   : > { %699 = vst.msk [vmem:[#allocation3 + $0x30] sm:$0xff] %vm692_vm3, %v684_v34  ;;  %720 = vst.msk [vmem:[#allocation6 + $0x10] sm:$0xff] %vm692_vm3, %v2407_v25  ;;  %v1926_v34 = vld [vmem:[%s464_s9] ss:$0 sm:$0xff]  ;;  %s3048_s9 = sld [smem:[#allocation12_spill]] }
 0x128   : > { %v1039_v44 = vld [vmem:[#allocation3 + $0x28] sm:$0xff]  ;;  %716 = vst.msk [vmem:[#allocation5 + $0x30] sm:$0xff] %vm701_vm4, %v2407_v25  ;;  %717 = vst.msk [vmem:[#allocation5 + $0x38] sm:$0xff] %vm701_vm4, %v2407_v25 }
 0x129   : > { %2134 = vmatpush3.xpose.msk.msra.mxu1 %vm692_vm3, %v882_v26  ;;  %721 = vst.msk [vmem:[#allocation6 + $0x18] sm:$0xff] %vm692_vm3, %v2407_v25  ;;  %722 = vst.msk [vmem:[#allocation6 + $0x20] sm:$0xff] %vm692_vm3, %v2407_v25 }
 0x12a   : > { %2135 = vmatprep.subr.msk.mxu1 %vm692_vm3, %v877_v32  ;;  %v1038_v42 = vld [vmem:[#allocation3 + $0x20] sm:$0xff]  ;;  %723 = vst.msk [vmem:[#allocation6 + $0x28] sm:$0xff] %vm692_vm3, %v2407_v25  ;;  %724 = vst.msk [vmem:[#allocation6 + $0x30] sm:$0xff] %vm692_vm3, %v2407_v25  ;;  %v2121_v26 = vpop.f32.mrf.mxu0 }
 0x12b   : > { %725 = vst.msk [vmem:[#allocation6 + $0x38] sm:$0xff] %vm692_vm3, %v2407_v25 }
 0x12c   : > { %v1041_v46 = vld [vmem:[#allocation3 + $0x38] sm:$0xff]  ;;  %v2784_v27 = vpop.f32.mrf.mxu0 }
 0x12d   : > { %2136 = vmatpush3.xpose.msk.msra.mxu1 %vm692_vm3, %v877_v32  ;;  %s1959_s18 = sshll.u32 %s3048_s9, 4 }
 0x12e   : > { %2137 = vmatprep.subr.msk.mxu1 %vm692_vm3, %v872_v35  ;;  %v1040_v45 = vld [vmem:[#allocation3 + $0x30] sm:$0xff]  ;;  %v2124_v28 = vpop.f32.mrf.mxu0  ;;  %s2933_s29 = scalar_lea.hbm %s3050_s16, %s1959_s18 }
 0x12f   : > { %v1011_v59 = vadd.f32 %v2124_v28, %v1926_v34 }
 0x130   : > { %v1005_v29 = vpop.f32.mrf.mxu0 }
 0x131   : > { %2138 = vmatpush3.xpose.msk.msra.mxu1 %vm692_vm3, %v872_v35 }
 0x132   : > { %2139 = vmatprep.subr.msk.mxu1 %vm692_vm3, %v867_v36  ;;  %v2127_v30 = vpop.f32.mrf.mxu0 }
 0x133   : > { %v1021_v48 = vadd.f32 %v2127_v30, %v1926_v34 }
 0x134   : > { %v1015_v35 = vpop.f32.mrf.mxu0 }
 0x135   : > { %2140 = vmatpush3.xpose.msk.msra.mxu1 %vm692_vm3, %v867_v36  ;;  %v2796_v36 = vld [vmem:[#allocation4 + $0x8] sm:$0xff]  ;;  %v1016_v54 = vadd.f32 %v1926_v34, %v1015_v35 }
 0x136   : > { %2141 = vmatprep.subr.msk.mxu1 %vm692_vm3, %v862_v37 }
 0x139   : > { %2142 = vmatpush3.xpose.msk.msra.mxu1 %vm692_vm3, %v862_v37  ;;  %v2798_v37 = vld [vmem:[#allocation4 + $0x10] sm:$0xff] }
 0x13a   : > { %2143 = vmatprep.subr.msk.mxu1 %vm692_vm3, %v857_v38 }
 0x13d   : > { %2144 = vmatpush3.xpose.msk.msra.mxu1 %vm692_vm3, %v857_v38 }
 0x13e   : > { %2145 = vmatprep.subr.msk.mxu1 %vm692_vm3, %v852_v39 }
 0x141   : > { %2146 = vmatpush3.xpose.msk.msra.mxu1 %vm692_vm3, %v852_v39  ;;  %v2130_v39 = vpop.f32.mrf.mxu0 }
 0x144   : > { %2148 = vmatmul.mubr.msk.f32.vlgmr.msra.gmra.mxu1 %vm692_vm3, %v1035_v41 }
 0x145   : > { %2150 = vmatprep.mubr.msk.f32.mxu1 %vm692_vm3, %v1036_v40 }
 0x148   : > { %2151 = vmatmul.mubr.msk.f32.gmra.mxu1 %vm692_vm3, %v1037_v43 }
 0x149   : > { %2153 = vmatprep.mubr.msk.f32.mxu1 %vm692_vm3, %v1038_v42  ;;  %v1031_v42 = vadd.f32 %v2130_v39, %v1926_v34 }
 0x14b   : > { %2159 = vmatprep.subr.mxu0 %v1031_v42 }
 0x14c   : > { %2154 = vmatmul.mubr.msk.f32.gmra.mxu1 %vm692_vm3, %v1039_v44  ;;  %2160 = vmatpush3.msra.mxu0 %v1031_v42 }
 0x14d   : > { %2156 = vmatprep.mubr.msk.f32.mxu1 %vm692_vm3, %v1040_v45  ;;  %v1025_v45 = vpop.f32.mrf.mxu0 }
 0x14e   : > { %v1026_v49 = vadd.f32 %v1926_v34, %v1025_v45 }
 0x150   : > { %2157 = vmatmul.mubr.msk.f32.gmra.mxu1 %vm692_vm3, %v1041_v46  ;;  %v2811_v46 = vld [vmem:[#allocation4 + $0x18] sm:$0xff]  ;;  %2161 = vmatprep.subr.mxu0 %v1026_v49 }
 0x151   : > { %2162 = vmatpush3.msra.mxu0 %v1026_v49 }
 0x152   : > { %2163 = vmatprep.subr.mxu0 %v1021_v48 }
 0x153   : > { %2164 = vmatpush3.msra.mxu0 %v1021_v48 }
 0x154   : > { %2165 = vmatprep.subr.mxu0 %v1016_v54 }
 0x155   : > { %2166 = vmatpush3.msra.mxu0 %v1016_v54 }
 0x156   : > { %2167 = vmatprep.subr.mxu0 %v1011_v59 }
 0x157   : > { %2168 = vmatpush3.msra.mxu0 %v1011_v59 }
 0x204   : > { %v2149_v0 = vpop.f32.mrf.mxu1 }
 0x205   : > { %v2738_v4 = vmul.f32 0.35355338, %v2149_v0  ;;  %v1006_v0 = vadd.f32 %v1926_v34, %v1005_v29 }
 0x206   : > { %v1157_v1 = vpop.f32.mrf.mxu1 }
 0x207   : > { %v2736_v2 = vmul.f32 0.35355338, %v1157_v1  ;;  %v1215_v10 = vsel %vm562_vm2, %v2738_v4, -inf  ;;  %2169 = vmatprep.subr.mxu0 %v1006_v0 }
 0x208   : > { %v2152_v3 = vpop.f32.mrf.mxu1  ;;  %2170 = vmatpush3.msra.mxu0 %v1006_v0 }
 0x209   : > { %v1212_v5 = vsel %vm562_vm2, %v2736_v2, -inf  ;;  %v2744_v9 = vmul.f32 0.35355338, %v2152_v3 }
 0x20a   : > { %1213 = vmax.xlane.f32.xlu0 %v1212_v5  ;;  %v1167_v6 = vpop.f32.mrf.mxu1  ;;  %v2849_v5 = vld [vmem:[#allocation4 + $0x38] sm:$0xff] }
 0x20b   : > { %v2742_v7 = vmul.f32 0.35355338, %v1167_v6  ;;  %v1221_v16 = vsel %vm562_vm2, %v2744_v9, -inf  ;;  %v1001_v6 = vadd.f32 %v2121_v26, %v1926_v34 }
 0x20c   : > { %v2155_v8 = vpop.f32.mrf.mxu1 }
 0x20d   : > { %v1218_v11 = vsel %vm562_vm2, %v2742_v7, -inf  ;;  %v2750_v13 = vmul.f32 0.35355338, %v2155_v8  ;;  %2171 = vmatprep.subr.mxu0 %v1001_v6 }
 0x20e   : > { %1216 = vmax.xlane.f32.xlu0 %v1215_v10  ;;  %1219 = vmax.xlane.f32.xlu1 %v1218_v11  ;;  %v1177_v12 = vpop.f32.mrf.mxu1 }
 0x20f   : > { %v2752_v14 = vmul.f32 0.35355338, %v1177_v12  ;;  %v1227_v19 = vsel %vm562_vm2, %v2750_v13, -inf  ;;  %v996_v12 = vadd.f32 %v1926_v34, %v2784_v27  ;;  %2172 = vmatpush3.msra.mxu0 %v1001_v6 }
 0x210   : > { %v2158_v15 = vpop.f32.mrf.mxu1 }
 0x211   : > { %v1224_v17 = vsel %vm562_vm2, %v2752_v14, -inf  ;;  %v2760_v20 = vmul.f32 0.35355338, %v2158_v15  ;;  %2173 = vmatprep.subr.mxu0 %v996_v12 }
 0x212   : > { %1222 = vmax.xlane.f32.xlu1 %v1221_v16  ;;  %1225 = vmax.xlane.f32.xlu0 %v1224_v17  ;;  %v1187_v18 = vpop.f32.mrf.mxu1 }
 0x213   : > { %v2762_v21 = vmul.f32 0.35355338, %v1187_v18  ;;  %v1233_v24 = vsel %vm562_vm2, %v2760_v20, -inf  ;;  %2174 = vmatpush3.msra.mxu0 %v996_v12 }
 0x215   : > { %v1230_v22 = vsel %vm562_vm2, %v2762_v21, -inf }
 0x216   : > { %1228 = vmax.xlane.f32.xlu1 %v1227_v19  ;;  %1231 = vmax.xlane.f32.xlu0 %v1230_v22 }
 0x21a   : > { %1234 = vmax.xlane.f32.xlu1 %v1233_v24 }
 0x293   : > { %v1214_v32 = vpop.xlane.xlu0 %1213 }
 0x294   : > { %v2789_v33 = vmax.f32 %v2786_v31, %v1214_v32 }
 0x296   : > { %v1244_v38 = vsub.f32 %v2786_v31, %v2789_v33  ;;  %1590 = vst.msk [vmem:[#allocation4] sm:$0xff] %vm701_vm4, %v2789_v33  ;;  %1270 = vperm.xlu0 %2261, %v2789_v33  }
 0x297   : > { %v1217_v40 = vpop.xlane.xlu0 %1216  ;;  %v1220_v41 = vpop.xlane.xlu1 %1219 }
 0x298   : > { %v2806_v43 = vmax.f32 %v2796_v36, %v1217_v40  ;;  %v2809_v44 = vmax.f32 %v2798_v37, %v1220_v41 }
 0x29a   : > { %v1245_v50 = vsub.f32 %v2796_v36, %v2806_v43  ;;  %1591 = vst.msk [vmem:[#allocation4 + $0x8] sm:$0xff] %vm701_vm4, %v2806_v43  ;;  %v1246_v51 = vsub.f32 %v2798_v37, %v2809_v44  ;;  %1592 = vst.msk [vmem:[#allocation4 + $0x10] sm:$0xff] %vm701_vm4, %v2809_v44  ;;  %1275 = vperm.xlu1 %2262, %v2806_v43  }
 0x29b   : > { %v1223_v52 = vpop.xlane.xlu1 %1222  ;;  %v1226_v53 = vpop.xlane.xlu0 %1225 }
 0x29c   : > { %v2825_v55 = vmax.f32 %v2811_v46, %v1223_v52  ;;  %v2828_v56 = vmax.f32 %v2813_v47, %v1226_v53  ;;  %v1254_v12 = vmul.f32 1.442695, %v1245_v50 }
 0x29e   : > { %v1247_v60 = vsub.f32 %v2811_v46, %v2825_v55  ;;  %1593 = vst.msk [vmem:[#allocation4 + $0x18] sm:$0xff] %vm701_vm4, %v2825_v55  ;;  %1285 = vperm.xlu1 %2262, %v2825_v55   ;;  %v1248_v61 = vsub.f32 %v2813_v47, %v2828_v56  ;;  %1594 = vst.msk [vmem:[#allocation4 + $0x20] sm:$0xff] %vm701_vm4, %v2828_v56 }
 0x29f   : > { %v1229_v62 = vpop.xlane.xlu1 %1228  ;;  %v1232_v63 = vpop.xlane.xlu0 %1231 }
 0x2a0   : > { %v2844_v1 = vmax.f32 %v2830_v57, %v1229_v62  ;;  %v2847_v3 = vmax.f32 %v2832_v58, %v1232_v63  ;;  %v1258_v36 = vmul.f32 1.442695, %v1247_v60  ;;  %v1260_v43 = vmul.f32 1.442695, %v1248_v61  ;;  %v1333_v61 = vld [vmem:[#allocation5 + $0x8] sm:$0xff] }
 0x2a2   : > { %v1249_v8 = vsub.f32 %v2830_v57, %v2844_v1  ;;  %1595 = vst.msk [vmem:[#allocation4 + $0x28] sm:$0xff] %vm701_vm4, %v2844_v1  ;;  %1280 = vperm.xlu1 %2262, %v2809_v44   ;;  %v1250_v10 = vsub.f32 %v2832_v58, %v2847_v3  ;;  %1596 = vst.msk [vmem:[#allocation4 + $0x30] sm:$0xff] %vm701_vm4, %v2847_v3  ;;  %v1332_v57 = vld [vmem:[#allocation5] sm:$0xff] }
 0x2a3   : > { %v1235_v11 = vpop.xlane.xlu1 %1234 }
 0x2a4   : > { %v2862_v15 = vmax.f32 %v2849_v5, %v1235_v11  ;;  %v1262_v31 = vmul.f32 1.442695, %v1249_v8  ;;  %v1264_v33 = vmul.f32 1.442695, %v1250_v10  ;;  %v1335_v8 = vld [vmem:[#allocation5 + $0x18] sm:$0xff] }
 0x2a6   : > { %1295 = vperm.xlu1 %2262, %v2844_v1   ;;  %v1251_v16 = vsub.f32 %v2849_v5, %v2862_v15  ;;  %1597 = vst.msk [vmem:[#allocation4 + $0x38] sm:$0xff] %vm701_vm4, %v2862_v15 }
 0x2a8   : > { %v1266_v37 = vmul.f32 1.442695, %v1251_v16 }
 0x2aa   : > { %1290 = vperm.xlu1 %2262, %v2828_v56  }
 0x2ae   : > { %1300 = vperm.xlu1 %2262, %v2847_v3  }
 0x2b2   : > { %1305 = vperm.xlu1 %2262, %v2862_v15  }
 0x311   : > { %v1271_v17 = vpop.permute.xlu0 %1270 }
 0x312   : > { %v1308_v18 = vsub.f32 %v2736_v2, %v1271_v17 }
 0x314   : > { %v1316_v19 = vmul.f32 1.442695, %v1308_v18  ;;  %v1252_v18 = vmul.f32 1.442695, %v1244_v38 }
 0x315   : > { %v1276_v22 = vpop.permute.xlu1 %1275 }
 0x316   : > { %2263 = vpow2.f32 %v1316_v19  ;;  %v1309_v23 = vsub.f32 %v2738_v4, %v1276_v22  ;;  %v1256_v19 = vmul.f32 1.442695, %v1246_v51  ;;  %v1334_v22 = vld [vmem:[#allocation5 + $0x10] sm:$0xff] }
 0x318   : > { %v1318_v24 = vmul.f32 1.442695, %v1309_v23 }
 0x319   : > { %v1286_v25 = vpop.permute.xlu1 %1285 }
 0x31a   : > { %2265 = vpow2.f32 %v1318_v24  ;;  %v1311_v26 = vsub.f32 %v2744_v9, %v1286_v25 }
 0x31c   : > { %v1322_v27 = vmul.f32 1.442695, %v1311_v26 }
 0x31d   : > { %v1281_v28 = vpop.permute.xlu1 %1280 }
 0x31e   : > { %2267 = vpow2.f32 %v1322_v27  ;;  %v1310_v29 = vsub.f32 %v2742_v7, %v1281_v28  ;;  %v1337_v27 = vld [vmem:[#allocation5 + $0x28] sm:$0xff] }
 0x320   : > { %v1320_v30 = vmul.f32 1.442695, %v1310_v29 }
 0x321   : > { %v1296_v32 = vpop.permute.xlu1 %1295 }
 0x322   : > { %2269 = vpow2.f32 %v1320_v30  ;;  %v1313_v2 = vsub.f32 %v2750_v13, %v1296_v32 }
 0x323   : > { %v2264_v34 = vpop.eup %2263 }
 0x324   : > { %v1326_v35 = vmul.f32 1.442695, %v1313_v2  ;;  %2175 = vmatprep.mubr.msk.f32.mxu0 %vm562_vm2, %v2264_v34  ;;  %v1348_v4 = vsel %vm562_vm2, %v2264_v34, 0.0  ;;  %v1336_v2 = vld [vmem:[#allocation5 + $0x20] sm:$0xff] }
 0x325   : > { %v1291_v39 = vpop.permute.xlu1 %1290  ;;  %1349 = vadd.xlane.f32.xlu1 %v1348_v4 }
 0x326   : > { %2271 = vpow2.f32 %v1326_v35  ;;  %v1312_v9 = vsub.f32 %v2752_v14, %v1291_v39 }
 0x327   : > { %v2266_v40 = vpop.eup %2265 }
 0x328   : > { %v1324_v41 = vmul.f32 1.442695, %v1312_v9  ;;  %2176 = vmatmul.mubr.msk.f32.vlgmr.msra.gmra.mxu0 %vm562_vm2, %v2266_v40  ;;  %v1351_v7 = vsel %vm562_vm2, %v2266_v40, 0.0  ;;  %v1338_v9 = vld [vmem:[#allocation5 + $0x30] sm:$0xff] }
 0x329   : > { %1352 = vadd.xlane.f32.xlu0 %v1351_v7  ;;  %v1301_v42 = vpop.permute.xlu1 %1300 }
 0x32a   : > { %2273 = vpow2.f32 %v1324_v41  ;;  %v1314_v13 = vsub.f32 %v2762_v21, %v1301_v42 }
 0x32b   : > { %v2268_v45 = vpop.eup %2267 }
 0x32c   : > { %v1328_v48 = vmul.f32 1.442695, %v1314_v13  ;;  %v1357_v49 = vsel %vm562_vm2, %v2268_v45, 0.0 }
 0x32d   : > { %v1306_v52 = vpop.permute.xlu1 %1305  ;;  %1358 = vadd.xlane.f32.xlu1 %v1357_v49 }
 0x32e   : > { %2275 = vpow2.f32 %v1328_v48  ;;  %v1315_v14 = vsub.f32 %v2760_v20, %v1306_v52 }
 0x32f   : > { %v2270_v53 = vpop.eup %2269 }
 0x330   : > { %v1330_v54 = vmul.f32 1.442695, %v1315_v14  ;;  %2178 = vmatprep.mubr.msk.f32.mxu0 %vm562_vm2, %v2270_v53  ;;  %v1354_v59 = vsel %vm562_vm2, %v2270_v53, 0.0 }
 0x331   : > { %1355 = vadd.xlane.f32.xlu0 %v1354_v59  ;;  %2179 = vmatmul.mubr.msk.f32.gmra.mxu0 %vm562_vm2, %v2268_v45  ;;  %v1339_v45 = vld [vmem:[#allocation5 + $0x38] sm:$0xff] }
 0x332   : > { %2277 = vpow2.f32 %v1330_v54 }
 0x333   : > { %v2272_v21 = vpop.eup %2271  ;;  %2279 = vpow2.f32 %v1254_v12 }
 0x334   : > { %v1363_v62 = vsel %vm562_vm2, %v2272_v21, 0.0  ;;  %2281 = vpow2.f32 %v1252_v18 }
 0x335   : > { %1364 = vadd.xlane.f32.xlu1 %v1363_v62  ;;  %2283 = vpow2.f32 %v1256_v19 }
 0x336   : > { %2285 = vpow2.f32 %v1258_v36 }
 0x337   : > { %v2274_v63 = vpop.eup %2273  ;;  %2287 = vpow2.f32 %v1260_v43 }
 0x338   : > { %2181 = vmatprep.mubr.msk.f32.mxu0 %vm562_vm2, %v2274_v63  ;;  %v1360_v0 = vsel %vm562_vm2, %v2274_v63, 0.0  ;;  %2289 = vpow2.f32 %v1262_v31 }
 0x339   : > { %1361 = vadd.xlane.f32.xlu0 %v1360_v0  ;;  %2182 = vmatmul.mubr.msk.f32.gmra.mxu0 %vm562_vm2, %v2272_v21  ;;  %2291 = vpow2.f32 %v1264_v33 }
 0x33a   : > { %2293 = vpow2.f32 %v1266_v37 }
 0x33b   : > { %v2276_v20 = vpop.eup %2275 }
 0x33c   : > { %2184 = vmatprep.mubr.msk.f32.mxu0 %vm562_vm2, %v2276_v20  ;;  %v1366_v6 = vsel %vm562_vm2, %v2276_v20, 0.0 }
 0x33d   : > { %1367 = vadd.xlane.f32.xlu0 %v1366_v6 }
 0x33f   : > { %v2278_v11 = vpop.eup %2277 }
 0x340   : > { %2185 = vmatmul.mubr.msk.f32.gmra.mxu0 %vm562_vm2, %v2278_v11  ;;  %v1369_v17 = vsel %vm562_vm2, %v2278_v11, 0.0  ;;  %v2280_v38 = vpop.eup %2279 }
 0x341   : > { %1370 = vadd.xlane.f32.xlu1 %v1369_v17  ;;  %v2282_v44 = vpop.eup %2281  ;;  %v1341_v3 = vmul.f32 %v2280_v38, %v1333_v61 }
 0x342   : > { %v2284_v46 = vpop.eup %2283  ;;  %v1340_v58 = vmul.f32 %v2282_v44, %v1332_v57 }
 0x343   : > { %v2286_v47 = vpop.eup %2285  ;;  %v1342_v25 = vmul.f32 %v2284_v46, %v1334_v22 }
 0x344   : > { %v2288_v50 = vpop.eup %2287  ;;  %v1343_v15 = vmul.f32 %v2286_v47, %v1335_v8 }
 0x345   : > { %v2290_v51 = vpop.eup %2289  ;;  %v1344_v4 = vmul.f32 %v2288_v50, %v1336_v2 }
 0x346   : > { %v2292_v55 = vpop.eup %2291  ;;  %v1345_v30 = vmul.f32 %v2290_v51, %v1337_v27 }
 0x347   : > { %v2294_v56 = vpop.eup %2293  ;;  %v1346_v7 = vmul.f32 %v2292_v55, %v1338_v9 }
 0x348   : > { %v1347_v52 = vmul.f32 %v2294_v56, %v1339_v45 }
 0x352   : > { %1404 = vperm.xlu1 %2262, %v2280_v38  }
 0x353   : > { %1399 = vperm.xlu0 %2261, %v2282_v44  }
 0x356   : > { %1409 = vperm.xlu1 %2262, %v2284_v46  }
 0x357   : > { %1414 = vperm.xlu0 %2261, %v2286_v47  }
 0x35a   : > { %1419 = vperm.xlu1 %2262, %v2288_v50  }
 0x35b   : > { %1424 = vperm.xlu0 %2261, %v2290_v51  }
 0x35e   : > { %1429 = vperm.xlu1 %2262, %v2292_v55  }
 0x35f   : > { %1434 = vperm.xlu0 %2261, %v2294_v56  }
 0x3ae   : > { %v1350_v60 = vpop.xlane.xlu1 %1349 }
 0x3af   : > { %v1372_v1 = vadd.f32 %v1350_v60, %v1340_v58 }
 0x3b1   : > { %1381 = vst.msk [vmem:[#allocation5] sm:$0xff] %vm701_vm4, %v1372_v1 }
 0x3b2   : > { %v1353_v5 = vpop.xlane.xlu0 %1352 }
 0x3b3   : > { %v1373_v10 = vadd.f32 %v1353_v5, %v1341_v3 }
 0x3b5   : > { %1382 = vst.msk [vmem:[#allocation5 + $0x8] sm:$0xff] %vm701_vm4, %v1373_v10 }
 0x3b6   : > { %v1359_v16 = vpop.xlane.xlu1 %1358 }
 0x3b7   : > { %v1375_v23 = vadd.f32 %v1359_v16, %v1343_v15 }
 0x3b8   : > { %v1601_v24 = vld [vmem:[#allocation5] sm:$0xff] }
 0x3b9   : > { %1384 = vst.msk [vmem:[#allocation5 + $0x18] sm:$0xff] %vm701_vm4, %v1375_v23  ;;  %2295 = vrcp.f32 %v1601_v24 }
 0x3ba   : > { %v1356_v26 = vpop.xlane.xlu0 %1355 }
 0x3bb   : > { %v1374_v28 = vadd.f32 %v1356_v26, %v1342_v25 }
 0x3bc   : > { %v1602_v29 = vld [vmem:[#allocation5 + $0x8] sm:$0xff] }
 0x3bd   : > { %1383 = vst.msk [vmem:[#allocation5 + $0x10] sm:$0xff] %vm701_vm4, %v1374_v28  ;;  %2297 = vrcp.f32 %v1602_v29 }
 0x3be   : > { %v1365_v32 = vpop.xlane.xlu1 %1364 }
 0x3bf   : > { %v1377_v34 = vadd.f32 %v1365_v32, %v1345_v30 }
 0x3c0   : > { %v1604_v35 = vld [vmem:[#allocation5 + $0x18] sm:$0xff] }
 0x3c1   : > { %1386 = vst.msk [vmem:[#allocation5 + $0x28] sm:$0xff] %vm701_vm4, %v1377_v34  ;;  %2299 = vrcp.f32 %v1604_v35 }
 0x3c2   : > { %v1362_v39 = vpop.xlane.xlu0 %1361 }
 0x3c3   : > { %v1376_v40 = vadd.f32 %v1362_v39, %v1344_v4 }
 0x3c4   : > { %v1603_v41 = vld [vmem:[#allocation5 + $0x10] sm:$0xff] }
 0x3c5   : > { %1385 = vst.msk [vmem:[#allocation5 + $0x20] sm:$0xff] %vm701_vm4, %v1376_v40  ;;  %2301 = vrcp.f32 %v1603_v41 }
 0x3c6   : > { %v2296_v42 = vpop.eup %2295  ;;  %v1368_v13 = vpop.xlane.xlu0 %1367 }
 0x3c7   : > { %v1378_v48 = vadd.f32 %v1368_v13, %v1346_v7  ;;  %1635 = vperm.xlu1 %2262, %v2296_v42  }
 0x3c8   : > { %v1606_v49 = vld [vmem:[#allocation5 + $0x28] sm:$0xff] }
 0x3c9   : > { %1387 = vst.msk [vmem:[#allocation5 + $0x30] sm:$0xff] %vm701_vm4, %v1378_v48  ;;  %2303 = vrcp.f32 %v1606_v49 }
 0x3ca   : > { %v2298_v14 = vpop.eup %2297  ;;  %v1371_v53 = vpop.xlane.xlu1 %1370 }
 0x3cb   : > { %v1379_v54 = vadd.f32 %v1371_v53, %v1347_v52  ;;  %1640 = vperm.xlu0 %2261, %v2298_v14  }
 0x3cc   : > { %v1605_v59 = vld [vmem:[#allocation5 + $0x20] sm:$0xff] }
 0x3cd   : > { %1388 = vst.msk [vmem:[#allocation5 + $0x38] sm:$0xff] %vm701_vm4, %v1379_v54  ;;  %2305 = vrcp.f32 %v1605_v59 }
 0x3ce   : > { %v2300_v21 = vpop.eup %2299 }
 0x3cf   : > { %1650 = vperm.xlu0 %2261, %v2300_v21  }
 0x3d0   : > { %v1607_v62 = vld [vmem:[#allocation5 + $0x30] sm:$0xff] }
 0x3d1   : > { %2307 = vrcp.f32 %v1607_v62 }
 0x3d2   : > { %v2302_v63 = vpop.eup %2301 }
 0x3d3   : > { %1645 = vperm.xlu1 %2262, %v2302_v63  }
 0x3d4   : > { %v1608_v0 = vld [vmem:[#allocation5 + $0x38] sm:$0xff] }
 0x3d5   : > { %2309 = vrcp.f32 %v1608_v0 }
 0x3d6   : > { %v2304_v20 = vpop.eup %2303 }
 0x3d7   : > { %1660 = vperm.xlu0 %2261, %v2304_v20  }
 0x3da   : > { %v2306_v6 = vpop.eup %2305 }
 0x3db   : > { %1655 = vperm.xlu1 %2262, %v2306_v6  }
 0x3de   : > { %v2308_v11 = vpop.eup %2307 }
 0x3df   : > { %1665 = vperm.xlu1 %2262, %v2308_v11  }
 0x3e2   : > { %v2310_v12 = vpop.eup %2309 }
 0x3e3   : > { %1670 = vperm.xlu0 %2261, %v2310_v12  }
 0x3e4   : > { %2324 = shalt.err (!%p2321_p8)
}
 0x3e5   : > { %s2325_s24 = scalar_lea.hbm %s2933_s29, 16  ;;  %s2329_s25 = scalar_lea.hbm %s3051_s21, 32 }
 0x3e6   : > { %p2326_p10 = scmp.ne.s32.totalorder %s2933_s29, %s2325_s24  ;;  %p2330_p13 = scmp.lt.s32.totalorder %s2933_s29, %s3051_s21 }
 0x3e7   : > { %p2331_p0 = scmp.lt.s32.totalorder %s2329_s25, %s2325_s24 }
 0x3e8   : > { %p2327_p11 = pnand %p2326_p10, %p2508_p3 }
 0x3e9   : > { %p2332_p1 = por %p2331_p0, %p2330_p13 }
 0x3ea   : > { %p2328_p12 = pneg %p2327_p11 }
 0x3ec   : > { %p2333_p2 = pnand %p2332_p1, %p2328_p12 }
 0x3ee   : > { %2336 = shalt.err (!%p2333_p2)
}
 0x3ef   : > { %2187 = dma.vmem_to_hbm [thread:$0]  (%p2508_p3), %s1715_s20, 16, %s2933_s29, %s1699_s26   ;;  %v1390_v17 = vld [vmem:[#allocation6 + $0x8] sm:$0xff]  ;;  %v1405_v18 = vpop.permute.xlu1 %1404  ;;  %v1389_v19 = vld [vmem:[#allocation6] sm:$0xff]  ;;  %v1400_v36 = vpop.permute.xlu0 %1399  ;;  %v1392_v46 = vld [vmem:[#allocation6 + $0x18] sm:$0xff] }
 0x3f0   : > { %v1438_v43 = vmul.f32 %v1405_v18, %v1390_v17  ;;  %v2177_v31 = vpop.f32.mrf.mxu0  ;;  %v1437_v33 = vmul.f32 %v1400_v36, %v1389_v19  ;;  %v1391_v50 = vld [vmem:[#allocation6 + $0x10] sm:$0xff]  ;;  %v1394_v1 = vld [vmem:[#allocation6 + $0x28] sm:$0xff]  ;;  %v1393_v5 = vld [vmem:[#allocation6 + $0x20] sm:$0xff] }
 0x3f1   : > { %v1396_v24 = vld [vmem:[#allocation6 + $0x38] sm:$0xff]  ;;  %v1395_v27 = vld [vmem:[#allocation6 + $0x30] sm:$0xff] }
 0x3f2   : > { %v1575_v37 = vadd.f32 %v2177_v31, %v1438_v43  ;;  %v1535_v38 = vpop.f32.mrf.mxu0 }
 0x3f3   : > { %v1574_v44 = vadd.f32 %v1535_v38, %v1437_v33  ;;  %v1415_v47 = vpop.permute.xlu0 %1414  ;;  %v1410_v51 = vpop.permute.xlu1 %1409 }
 0x3f4   : > { %1583 = vst.msk [vmem:[#allocation6 + $0x8] sm:$0xff] %vm692_vm3, %v1575_v37  ;;  %v1440_v55 = vmul.f32 %v1415_v47, %v1392_v46  ;;  %v2180_v56 = vpop.f32.mrf.mxu0  ;;  %v1439_v57 = vmul.f32 %v1410_v51, %v1391_v50 }
 0x3f5   : > { %1582 = vst.msk [vmem:[#allocation6] sm:$0xff] %vm692_vm3, %v1574_v44 }
 0x3f6   : > { %v1577_v58 = vadd.f32 %v2180_v56, %v1440_v55  ;;  %v1545_v60 = vpop.f32.mrf.mxu0 }
 0x3f7   : > { %v1576_v61 = vadd.f32 %v1545_v60, %v1439_v57  ;;  %v1425_v3 = vpop.permute.xlu0 %1424  ;;  %v1420_v8 = vpop.permute.xlu1 %1419 }
 0x3f8   : > { %1585 = vst.msk [vmem:[#allocation6 + $0x18] sm:$0xff] %vm692_vm3, %v1577_v58  ;;  %v1442_v10 = vmul.f32 %v1425_v3, %v1394_v1  ;;  %v1441_v16 = vmul.f32 %v1420_v8, %v1393_v5 }
 0x3f9   : > { %1584 = vst.msk [vmem:[#allocation6 + $0x10] sm:$0xff] %vm692_vm3, %v1576_v61  ;;  %v2183_v15 = vpop.f32.mrf.mxu0 }
 0x3fa   : > { %v1579_v22 = vadd.f32 %v2183_v15, %v1442_v10 }
 0x3fb   : > { %v1555_v23 = vpop.f32.mrf.mxu0  ;;  %v1435_v25 = vpop.permute.xlu0 %1434  ;;  %v1626_v40 = vld [vmem:[#allocation6 + $0x8] sm:$0xff] }
 0x3fc   : > { %1587 = vst.msk [vmem:[#allocation6 + $0x28] sm:$0xff] %vm692_vm3, %v1579_v22  ;;  %v1578_v26 = vadd.f32 %v1555_v23, %v1441_v16  ;;  %v1430_v28 = vpop.permute.xlu1 %1429  ;;  %v1444_v29 = vmul.f32 %v1435_v25, %v1396_v24  ;;  %v1625_v39 = vld [vmem:[#allocation6] sm:$0xff] }
 0x3fd   : > { %v1443_v32 = vmul.f32 %v1430_v28, %v1395_v27 }
 0x3fe   : > { %1586 = vst.msk [vmem:[#allocation6 + $0x20] sm:$0xff] %vm692_vm3, %v1578_v26 }
 0x3ff   : > { %v1628_v42 = vld [vmem:[#allocation6 + $0x18] sm:$0xff] }
 0x400   : > { %v2186_v30 = vpop.f32.mrf.mxu0  ;;  %v1627_v48 = vld [vmem:[#allocation6 + $0x10] sm:$0xff] }
 0x401   : > { %v1581_v2 = vadd.f32 %v2186_v30, %v1444_v29 }
 0x402   : > { %v1565_v34 = vpop.f32.mrf.mxu0 }
 0x403   : > { %1589 = vst.msk [vmem:[#allocation6 + $0x38] sm:$0xff] %vm692_vm3, %v1581_v2  ;;  %v1580_v35 = vadd.f32 %v1565_v34, %v1443_v32  ;;  %v1630_v14 = vld [vmem:[#allocation6 + $0x28] sm:$0xff] }
 0x405   : > { %1588 = vst.msk [vmem:[#allocation6 + $0x30] sm:$0xff] %vm692_vm3, %v1580_v35  ;;  %v1629_v59 = vld [vmem:[#allocation6 + $0x20] sm:$0xff] }
 0x40a   : > { %v1632_v6 = vld [vmem:[#allocation6 + $0x38] sm:$0xff] }
 0x40c   : > { %v1631_v63 = vld [vmem:[#allocation6 + $0x30] sm:$0xff] }
 0x442   : > { %v1636_v4 = vpop.permute.xlu1 %1635 }
 0x443   : > { %v1673_v9 = vmul.f32 %v1636_v4, %v1625_v39 }
 0x445   : > { %1681 = vst.msk [vmem:[%s2573_s11] sm:$0xff] %vm692_vm3, %v1673_v9 }
 0x446   : > { %v1641_v41 = vpop.permute.xlu0 %1640 }
 0x447   : > { %v1674_v7 = vmul.f32 %v1641_v41, %v1626_v40 }
 0x449   : > { %1682 = vst.msk [vmem:[%s2573_s11 + $0x8] sm:$0xff] %vm692_vm3, %v1674_v7 }
 0x44a   : > { %v1651_v13 = vpop.permute.xlu0 %1650 }
 0x44b   : > { %v1676_v45 = vmul.f32 %v1651_v13, %v1628_v42 }
 0x44d   : > { %1684 = vst.msk [vmem:[%s2573_s11 + $0x18] sm:$0xff] %vm692_vm3, %v1676_v45 }
 0x44e   : > { %v1646_v49 = vpop.permute.xlu1 %1645 }
 0x44f   : > { %v1675_v52 = vmul.f32 %v1646_v49, %v1627_v48 }
 0x451   : > { %1683 = vst.msk [vmem:[%s2573_s11 + $0x10] sm:$0xff] %vm692_vm3, %v1675_v52 }
 0x452   : > { %v1661_v53 = vpop.permute.xlu0 %1660 }
 0x453   : > { %v1678_v54 = vmul.f32 %v1661_v53, %v1630_v14 }
 0x455   : > { %1686 = vst.msk [vmem:[%s2573_s11 + $0x28] sm:$0xff] %vm692_vm3, %v1678_v54 }
 0x456   : > { %v1656_v21 = vpop.permute.xlu1 %1655 }
 0x457   : > { %v1677_v62 = vmul.f32 %v1656_v21, %v1629_v59 }
 0x459   : > { %1685 = vst.msk [vmem:[%s2573_s11 + $0x20] sm:$0xff] %vm692_vm3, %v1677_v62 }
 0x45a   : > { %v1666_v0 = vpop.permute.xlu1 %1665 }
 0x45b   : > { %v1679_v20 = vmul.f32 %v1666_v0, %v1631_v63 }
 0x45d   : > { %1687 = vst.msk [vmem:[%s2573_s11 + $0x30] sm:$0xff] %vm692_vm3, %v1679_v20 }
 0x45e   : > { %v1671_v11 = vpop.permute.xlu0 %1670 }
 0x45f   : > { %v1680_v12 = vmul.f32 %v1671_v11, %v1632_v6 }
 0x461   : > { %1688 = vst.msk [vmem:[%s2573_s11 + $0x38] sm:$0xff] %vm692_vm3, %v1680_v12 }
 0x462 PF: > { %s3053_s23 = sld [smem:[#allocation15_spill]] }
 0x463   : > { %s3054_s27 = sld [smem:[#allocation10_spill]] }
 0x468   : > { %p2193_p3 = scmp.ge.s32.totalorder %s3053_s23, 2 }
 0x469   : > { %s1738_s28 = sand.u32 1, %s3054_s27  }
 0x46a   : > { %p2190_p4 = pnand %p2193_p3, %p2518_p9  ;;  %s1739_s18 = scalar_lea.sflag [#allocation8], %s1738_s28 }
 0x46c   : > { %p2191_p5 = pneg %p2190_p4 }
 0x46e   : > { %2370 = dma.done.wait (%p2191_p5), %s1739_s18, 16  }
 0x46f   : > { %2372 = vsyncadd (%p2191_p5), %s1739_s18, 4294967280  ;;  %s23_s16 = sadd.s32 1, %s3053_s23   ;;  %s3056_s20 = sld [smem:[#allocation11_spill]] }
 0x470   : > { %p20_p6 = scmp.ge.s32.totalorder %s23_s16, 18   ;;  %s3057_s11 = sld [smem:[#allocation20_spill]] }
 0x471   : > { %s3058_s12 = sld [smem:[#allocation13_spill]]  ;;  %s3062_s30 = smov %s2379_s10 }
 0x472   : > { %s3059_s13 = sld [smem:[#allocation14_spill]]  ;;  %22 = sbr.rel (!%p20_p6) target bundleno = 10 (0xa), region = 131 }
 0x473   : > { %s3060_s14 = sld [smem:[#allocation16_spill]] }
 0x474   : > { %s3061_s15 = sld [smem:[#allocation18_spill]] }
 0x475   : > { %s3063_s10 = smov %s3056_s20 }
 0x477   :  { %1743 = vsyncpa [#allocation8], 1 }
 0x478   :  { %1745 = vsyncpa [#allocation8 + $0x1], 1 }

</bundles_post_ra>
